<compile_context>
chip_gen: v5e
topology: v5e:2x2
jax: 0.10.0
libtpu: 0.0.40
codegen_flags: <defaults>
</compile_context>

<pallas_src>
import functools

import jax
import jax.numpy as jnp
import numpy as np
from jax.experimental import pallas as pl
from jax.experimental.pallas import tpu as pltpu

DROP_P = 0.5
COMPUTE_DTYPE = jnp.bfloat16          # MXU-native input dtype
_VMEM_LIMIT = 32 * 1024 * 1024        # raise v5e's 16 MiB default scoped VMEM


def _pick_node_tile(n):
    """Node tile: as large as possible (<=256), prefer >=2 grid steps (megacore)."""
    for t in (256, 128, 64, 32, 16, 8):
        if n % t == 0 and n // t >= 2:
            return t
    return n


def _pick_k_tile(n):
    """Reduction tile over the neighbor (N) axis; lane-aligned (x128) when possible."""
    for t in (1024, 512, 256, 128):
        if n % t == 0:
            return t
    return n                          # small graphs: full reduction in one step


# ----------------------------------------------------------------------------
# Kernels
# ----------------------------------------------------------------------------
def _fused_layer_kernel(*refs, apply_relu, apply_dropout):
    """acc += adj_tile @ x_k ; finalize: y = epilogue(acc @ W^T)."""
    if apply_dropout:
        adj_ref, x_ref, w_ref, mask_ref, o_ref, acc_ref = refs
    else:
        adj_ref, x_ref, w_ref, o_ref, acc_ref = refs
        mask_ref = None
    k = pl.program_id(1)

    @pl.when(k == 0)
    def _():
        acc_ref[...] = jnp.zeros_like(acc_ref)

    acc_ref[...] += jnp.dot(adj_ref[...], x_ref[...],
                            preferred_element_type=jnp.float32)

    @pl.when(k == pl.num_programs(1) - 1)
    def _():
        h = acc_ref[...].astype(w_ref.dtype)
        y = jnp.dot(h, w_ref[...], preferred_element_type=jnp.float32)
        if apply_relu:
            y = jnp.maximum(y, 0.0)
        if mask_ref is not None:
            y = y * mask_ref[...].astype(jnp.float32)
        o_ref[...] = y.astype(o_ref.dtype)


def _agg_layer_kernel(*refs, apply_relu, apply_dropout):
    """acc += adj_tile @ xw_k ; finalize: y = epilogue(acc)."""
    if apply_dropout:
        adj_ref, xw_ref, mask_ref, o_ref, acc_ref = refs
    else:
        adj_ref, xw_ref, o_ref, acc_ref = refs
        mask_ref = None
    k = pl.program_id(1)

    @pl.when(k == 0)
    def _():
        acc_ref[...] = jnp.zeros_like(acc_ref)

    acc_ref[...] += jnp.dot(adj_ref[...], xw_ref[...],
                            preferred_element_type=jnp.float32)

    @pl.when(k == pl.num_programs(1) - 1)
    def _():
        y = acc_ref[...]
        if apply_relu:
            y = jnp.maximum(y, 0.0)
        if mask_ref is not None:
            y = y * mask_ref[...].astype(jnp.float32)
        o_ref[...] = y.astype(o_ref.dtype)


def _linear_kernel(x_ref, w_ref, o_ref):
    o_ref[...] = jnp.dot(x_ref[...], w_ref[...],
                         preferred_element_type=jnp.float32).astype(o_ref.dtype)


# ----------------------------------------------------------------------------
# pallas_call wrappers
# ----------------------------------------------------------------------------
def _itemsize(x):
    return jnp.dtype(x).itemsize


def _linear_call(x, wt, *, tn, out_dtype):
    n, din = x.shape
    dout = wt.shape[1]
    flops = 2 * n * din * dout
    bytes_accessed = (n * din * _itemsize(x.dtype) + din * dout * _itemsize(wt.dtype)
                      + n * dout * _itemsize(out_dtype))
    return pl.pallas_call(
        _linear_kernel,
        out_shape=jax.ShapeDtypeStruct((n, dout), out_dtype),
        grid_spec=pltpu.PrefetchScalarGridSpec(
            num_scalar_prefetch=0,
            grid=(n // tn,),
            in_specs=[
                pl.BlockSpec((tn, din), lambda i: (i, 0)),
                pl.BlockSpec((din, dout), lambda i: (0, 0)),
            ],
            out_specs=pl.BlockSpec((tn, dout), lambda i: (i, 0)),
        ),
        compiler_params=pltpu.CompilerParams(
            dimension_semantics=("parallel",),
            vmem_limit_bytes=_VMEM_LIMIT),
        cost_estimate=pl.CostEstimate(flops=flops, transcendentals=0,
                                      bytes_accessed=bytes_accessed),
    )(x, wt)


def _fused_call(adj, x, wt, mask, *, apply_relu, tn, tk, out_dtype):
    n = adj.shape[0]
    din, dout = wt.shape
    apply_dropout = mask is not None
    kernel = functools.partial(_fused_layer_kernel,
                               apply_relu=apply_relu, apply_dropout=apply_dropout)

    in_specs = [
        pl.BlockSpec((tn, tk), lambda i, k: (i, k)),        # adj tile (streamed)
        pl.BlockSpec((tk, din), lambda i, k: (k, 0)),       # x K-slab
        pl.BlockSpec((din, dout), lambda i, k: (0, 0)),     # W^T (grid-invariant)
    ]
    args = [adj, x, wt]
    if apply_dropout:
        in_specs.append(pl.BlockSpec((tn, dout), lambda i, k: (i, 0)))
        args.append(mask)

    flops = 2 * n * n * din + 2 * n * din * dout
    bytes_accessed = (n * n * _itemsize(adj.dtype) + n * din * _itemsize(x.dtype)
                      + din * dout * _itemsize(wt.dtype)
                      + n * dout * _itemsize(out_dtype)
                      + (n * dout * _itemsize(mask.dtype) if apply_dropout else 0))
    return pl.pallas_call(
        kernel,
        out_shape=jax.ShapeDtypeStruct((n, dout), out_dtype),
        grid_spec=pltpu.PrefetchScalarGridSpec(
            num_scalar_prefetch=0,
            grid=(n // tn, n // tk),
            in_specs=in_specs,
            out_specs=pl.BlockSpec((tn, dout), lambda i, k: (i, 0)),
            scratch_shapes=[pltpu.VMEM((tn, din), jnp.float32)],
        ),
        compiler_params=pltpu.CompilerParams(
            dimension_semantics=("parallel", "arbitrary"),
            vmem_limit_bytes=_VMEM_LIMIT),
        cost_estimate=pl.CostEstimate(flops=flops, transcendentals=0,
                                      bytes_accessed=bytes_accessed),
    )(*args)


def _agg_call(adj, xw, mask, *, apply_relu, tn, tk, out_dtype):
    n = adj.shape[0]
    dout = xw.shape[1]
    apply_dropout = mask is not None
    kernel = functools.partial(_agg_layer_kernel,
                               apply_relu=apply_relu, apply_dropout=apply_dropout)

    in_specs = [
        pl.BlockSpec((tn, tk), lambda i, k: (i, k)),        # adj tile (streamed)
        pl.BlockSpec((tk, dout), lambda i, k: (k, 0)),      # xw K-slab
    ]
    args = [adj, xw]
    if apply_dropout:
        in_specs.append(pl.BlockSpec((tn, dout), lambda i, k: (i, 0)))
        args.append(mask)

    flops = 2 * n * n * dout
    bytes_accessed = (n * n * _itemsize(adj.dtype) + n * dout * _itemsize(xw.dtype)
                      + n * dout * _itemsize(out_dtype)
                      + (n * dout * _itemsize(mask.dtype) if apply_dropout else 0))
    return pl.pallas_call(
        kernel,
        out_shape=jax.ShapeDtypeStruct((n, dout), out_dtype),
        grid_spec=pltpu.PrefetchScalarGridSpec(
            num_scalar_prefetch=0,
            grid=(n // tn, n // tk),
            in_specs=in_specs,
            out_specs=pl.BlockSpec((tn, dout), lambda i, k: (i, 0)),
            scratch_shapes=[pltpu.VMEM((tn, dout), jnp.float32)],
        ),
        compiler_params=pltpu.CompilerParams(
            dimension_semantics=("parallel", "arbitrary"),
            vmem_limit_bytes=_VMEM_LIMIT),
        cost_estimate=pl.CostEstimate(flops=flops, transcendentals=0,
                                      bytes_accessed=bytes_accessed),
    )(*args)


# ----------------------------------------------------------------------------
# GCN forward
# ----------------------------------------------------------------------------
def gcn_layer(adj, x, wt, mask, *, apply_relu, out_dtype):
    """One GCN layer: epilogue(adj @ x @ W^T) with cost-based matmul ordering."""
    n = adj.shape[0]
    din, dout = wt.shape
    tn = _pick_node_tile(n)
    tk = _pick_k_tile(n)
    assert n % tn == 0 and n % tk == 0
    if dout < din:
        # cheap linear first, then aggregate the narrow features
        xw = _linear_call(x, wt, tn=tn, out_dtype=COMPUTE_DTYPE)
        return _agg_call(adj, xw, mask, apply_relu=apply_relu,
                         tn=tn, tk=tk, out_dtype=out_dtype)
    return _fused_call(adj, x, wt, mask, apply_relu=apply_relu,
                       tn=tn, tk=tk, out_dtype=out_dtype)


def net_gcn_forward(x, adj, weights, *, val_test=False, rng=None):
    """Mirrors net_gcn.forward.  `weights[ln]` has torch Linear shape (out, in)."""
    layer_num = len(weights)
    n = adj.shape[0]
    adj_c = adj.astype(COMPUTE_DTYPE)
    h = x.astype(COMPUTE_DTYPE)
    for ln, w in enumerate(weights):
        is_last = ln == layer_num - 1
        wt = jnp.transpose(w).astype(COMPUTE_DTYPE)   # (in, out)
        mask = None
        if (not is_last) and (not val_test):
            if rng is None:
                raise ValueError("rng key is required for training-mode dropout")
            key = jax.random.fold_in(rng, ln)          # distinct stream per layer
            keep = jax.random.bernoulli(key, 1.0 - DROP_P, (n, w.shape[0]))
            mask = (keep.astype(jnp.float32) *
                    (1.0 / (1.0 - DROP_P))).astype(COMPUTE_DTYPE)  # 0.0 or 2.0, exact
        out_dtype = jnp.float32 if is_last else COMPUTE_DTYPE
        h = gcn_layer(adj_c, h, wt, mask, apply_relu=not is_last, out_dtype=out_dtype)
    return h


def _reference_forward(x, adj, weights):
    """Pure-JAX eval-mode reference mirroring the kernel's bf16-in / f32-acc numerics."""
    cd = COMPUTE_DTYPE
    layer_num = len(weights)
    adj_c = adj.astype(cd)
    h = x.astype(cd)
    for ln, w in enumerate(weights):
        is_last = ln == layer_num - 1
        dout, din = w.shape
        wt = w.T.astype(cd)
        if dout < din:
            xw = jnp.dot(h, wt, preferred_element_type=jnp.float32).astype(cd)
            y = jnp.dot(adj_c, xw, preferred_element_type=jnp.float32)
        else:
            hh = jnp.dot(adj_c, h, preferred_element_type=jnp.float32).astype(cd)
            y = jnp.dot(hh, wt, preferred_element_type=jnp.float32)
        if is_last:
            return y
        h = jnp.maximum(y, 0.0).astype(cd)
    return h.astype(jnp.float32)


def init_params(key, embedding_dim):
    # nn.Linear(in, out, bias=False): weight shape (out, in), U(-1/sqrt(in), 1/sqrt(in))
    weights = []
    for ln in range(len(embedding_dim) - 1):
        key, sub = jax.random.split(key)
        fan_in, fan_out = embedding_dim[ln], embedding_dim[ln + 1]
        bound = 1.0 / np.sqrt(fan_in)
        weights.append(jax.random.uniform(
            sub, (fan_out, fan_in), jnp.float32, minval=-bound, maxval=bound))
    return weights


if __name__ == "__main__":
    # Small synthetic GCN: 256 nodes, embedding dims [128, 256, 128] (2 layers).
    # Layer 0 (Din<=Dout) exercises the fused kernel; layer 1 (Dout<Din) exercises
    # the linear-then-aggregate path.
    N = 256
    embedding_dim = [128, 256, 128]

    key = jax.random.PRNGKey(0)
    k_x, k_adj, k_w, k_drop = jax.random.split(key, 4)

    x = jax.random.normal(k_x, (N, embedding_dim[0]), jnp.float32)

    # Row-normalized random adjacency with self loops (dense stand-in for spmm).
    a = (jax.random.uniform(k_adj, (N, N)) < 0.05).astype(jnp.float32)
    a = jnp.clip(a + a.T + jnp.eye(N, dtype=jnp.float32), 0.0, 1.0)
    adj = a / jnp.sum(a, axis=1, keepdims=True)

    weights = init_params(k_w, embedding_dim)

    # Eval path (val_test=True): deterministic, check against the mirrored reference.
    eval_fn = jax.jit(functools.partial(net_gcn_forward, val_test=True))
    out_eval = jax.block_until_ready(eval_fn(x, adj, weights))
    ref = _reference_forward(x, adj, weights)
    np.testing.assert_allclose(np.asarray(out_eval), np.asarray(ref),
                               rtol=1e-2, atol=1e-2)

    # Training path (val_test=False): exercises the fused dropout epilogue.
    train_fn = jax.jit(functools.partial(net_gcn_forward, val_test=False))
    out_train = jax.block_until_ready(train_fn(x, adj, weights, rng=k_drop))
    assert out_train.shape == (N, embedding_dim[-1])
    assert bool(jnp.all(jnp.isfinite(out_train)))

    print("KERNEL_OK")
</pallas_src>

<mosaic_0001>
module attributes {stable_mosaic.version = 11 : i64} {
  func.func @_fused_layer_kernel(%arg0: i32, %arg1: i32, %arg2: memref<128x256xbf16, #tpu.memory_space<vmem>>, %arg3: memref<256x128xbf16, #tpu.memory_space<vmem>>, %arg4: memref<128x256xbf16, #tpu.memory_space<vmem>>, %arg5: memref<128x256xbf16, #tpu.memory_space<vmem>>, %arg6: memref<128x128xf32, #tpu.memory_space<vmem>>) attributes {dimension_semantics = [#tpu.dimension_semantics<parallel>, #tpu.dimension_semantics<arbitrary>], iteration_bounds = array<i64: 2, 1>, scalar_prefetch = 0 : i64, scratch_operands = 1 : i64, tpu.core_type = #tpu.core_type<tc>, window_params = [{transform_indices = @transform_0, window_bounds = array<i64: 128, 256>}, {transform_indices = @transform_1, window_bounds = array<i64: 256, 128>}, {pipeline_mode = #tpu.pipeline_mode<synchronous>, transform_indices = @transform_2, window_bounds = array<i64: 128, 256>}, {transform_indices = @transform_3, window_bounds = array<i64: 128, 256>}]} {
    %c0_i32 = arith.constant 0 : i32
    %0 = arith.cmpi eq, %arg1, %c0_i32 : i32
    %1 = arith.extui %0 : i1 to i32
    %c0_i32_0 = arith.constant 0 : i32
    %2 = arith.cmpi ne, %1, %c0_i32_0 : i32
    scf.if %2 {
      %cst_10 = arith.constant 0.000000e+00 : f32
      %12 = vector.broadcast %cst_10 : f32 to vector<128x128xf32>
      %c0_11 = arith.constant 0 : index
      %c0_12 = arith.constant 0 : index
      %13 = vector.load %arg6[%c0_11, %c0_12] : memref<128x128xf32, #tpu.memory_space<vmem>>, vector<128x128xf32>
      tpu.vector_store %arg6[%c0_11, %c0_12], %12 {strides = array<i32>} : memref<128x128xf32, #tpu.memory_space<vmem>>, vector<128x128xf32>,
    } else {
    }
    %c0 = arith.constant 0 : index
    %c0_1 = arith.constant 0 : index
    %3 = vector.load %arg6[%c0, %c0_1] : memref<128x128xf32, #tpu.memory_space<vmem>>, vector<128x128xf32>
    %c0_2 = arith.constant 0 : index
    %c0_3 = arith.constant 0 : index
    %4 = vector.load %arg2[%c0_2, %c0_3] : memref<128x256xbf16, #tpu.memory_space<vmem>>, vector<128x256xbf16>
    %c0_4 = arith.constant 0 : index
    %c0_5 = arith.constant 0 : index
    %5 = vector.load %arg3[%c0_4, %c0_5] : memref<256x128xbf16, #tpu.memory_space<vmem>>, vector<256x128xbf16>
    %cst = arith.constant dense<0.000000e+00> : vector<128x128xf32>
    %6 = tpu.matmul %4, %5, %cst {dimension_numbers = #tpu.dot_dimension_numbers<[1], [0], [0], [1], [0, 0, 1, 1], [], []>} : vector<128x256xbf16>, vector<256x128xbf16>, vector<128x128xf32> -> vector<128x128xf32>
    %7 = arith.addf %3, %6 : vector<128x128xf32>
    %c0_6 = arith.constant 0 : index
    %c0_7 = arith.constant 0 : index
    %8 = vector.load %arg6[%c0_6, %c0_7] : memref<128x128xf32, #tpu.memory_space<vmem>>, vector<128x128xf32>
    tpu.vector_store %arg6[%c0_6, %c0_7], %7 {strides = array<i32>} : memref<128x128xf32, #tpu.memory_space<vmem>>, vector<128x128xf32>,
    %c0_i32_8 = arith.constant 0 : i32
    %9 = arith.cmpi eq, %arg1, %c0_i32_8 : i32
    %10 = arith.extui %9 : i1 to i32
    %c0_i32_9 = arith.constant 0 : i32
    %11 = arith.cmpi ne, %10, %c0_i32_9 : i32
    scf.if %11 {
      %c0_10 = arith.constant 0 : index
      %c0_11 = arith.constant 0 : index
      %12 = vector.load %arg6[%c0_10, %c0_11] : memref<128x128xf32, #tpu.memory_space<vmem>>, vector<128x128xf32>
      %13 = arith.truncf %12 : vector<128x128xf32> to vector<128x128xbf16>
      %c0_12 = arith.constant 0 : index
      %c0_13 = arith.constant 0 : index
      %14 = vector.load %arg4[%c0_12, %c0_13] : memref<128x256xbf16, #tpu.memory_space<vmem>>, vector<128x256xbf16>
      %cst_14 = arith.constant dense<0.000000e+00> : vector<128x256xf32>
      %15 = tpu.matmul %13, %14, %cst_14 {dimension_numbers = #tpu.dot_dimension_numbers<[1], [0], [0], [1], [0, 0, 1, 1], [], []>} : vector<128x128xbf16>, vector<128x256xbf16>, vector<128x256xf32> -> vector<128x256xf32>
      %cst_15 = arith.constant 0.000000e+00 : f32
      %16 = vector.broadcast %cst_15 : f32 to vector<128x256xf32>
      %17 = arith.maximumf %15, %16 : vector<128x256xf32>
      %18 = arith.truncf %17 : vector<128x256xf32> to vector<128x256xbf16>
      %c0_16 = arith.constant 0 : index
      %c0_17 = arith.constant 0 : index
      %19 = vector.load %arg5[%c0_16, %c0_17] : memref<128x256xbf16, #tpu.memory_space<vmem>>, vector<128x256xbf16>
      tpu.vector_store %arg5[%c0_16, %c0_17], %18 {strides = array<i32>} : memref<128x256xbf16, #tpu.memory_space<vmem>>, vector<128x256xbf16>,
    } else {
    }
    return
  }
  func.func @transform_0(%arg0: i32, %arg1: i32) -> (i32, i32) {
    %c0_i32 = arith.constant 0 : i32
    return %arg0, %arg1 : i32, i32
  }
  func.func @transform_1(%arg0: i32, %arg1: i32) -> (i32, i32) {
    %c0_i32 = arith.constant 0 : i32
    %c0_i32_0 = arith.constant 0 : i32
    return %arg1, %c0_i32 : i32, i32
  }
  func.func @transform_2(%arg0: i32, %arg1: i32) -> (i32, i32) {
    %c0_i32 = arith.constant 0 : i32
    %c0_i32_0 = arith.constant 0 : i32
    %c0_i32_1 = arith.constant 0 : i32
    return %c0_i32, %c0_i32_0 : i32, i32
  }
  func.func @transform_3(%arg0: i32, %arg1: i32) -> (i32, i32) {
    %c0_i32 = arith.constant 0 : i32
    %c0_i32_0 = arith.constant 0 : i32
    return %arg0, %c0_i32 : i32, i32
  }
}

module attributes {stable_mosaic.version = 11 : i64} {
  func.func @_linear_kernel(%arg0: i32, %arg1: memref<128x256xbf16, #tpu.memory_space<vmem>>, %arg2: memref<256x128xbf16, #tpu.memory_space<vmem>>, %arg3: memref<128x128xbf16, #tpu.memory_space<vmem>>) attributes {dimension_semantics = [#tpu.dimension_semantics<parallel>], iteration_bounds = array<i64: 2>, scalar_prefetch = 0 : i64, scratch_operands = 0 : i64, tpu.core_type = #tpu.core_type<tc>, window_params = [{transform_indices = @transform_0, window_bounds = array<i64: 128, 256>}, {pipeline_mode = #tpu.pipeline_mode<synchronous>, transform_indices = @transform_1, window_bounds = array<i64: 256, 128>}, {transform_indices = @transform_2, window_bounds = array<i64: 128, 128>}]} {
    %c0 = arith.constant 0 : index
    %c0_0 = arith.constant 0 : index
    %0 = vector.load %arg1[%c0, %c0_0] : memref<128x256xbf16, #tpu.memory_space<vmem>>, vector<128x256xbf16>
    %c0_1 = arith.constant 0 : index
    %c0_2 = arith.constant 0 : index
    %1 = vector.load %arg2[%c0_1, %c0_2] : memref<256x128xbf16, #tpu.memory_space<vmem>>, vector<256x128xbf16>
    %cst = arith.constant dense<0.000000e+00> : vector<128x128xf32>
    %2 = tpu.matmul %0, %1, %cst {dimension_numbers = #tpu.dot_dimension_numbers<[1], [0], [0], [1], [0, 0, 1, 1], [], []>} : vector<128x256xbf16>, vector<256x128xbf16>, vector<128x128xf32> -> vector<128x128xf32>
    %3 = arith.truncf %2 : vector<128x128xf32> to vector<128x128xbf16>
    %c0_3 = arith.constant 0 : index
    %c0_4 = arith.constant 0 : index
    %4 = vector.load %arg3[%c0_3, %c0_4] : memref<128x128xbf16, #tpu.memory_space<vmem>>, vector<128x128xbf16>
    tpu.vector_store %arg3[%c0_3, %c0_4], %3 {strides = array<i32>} : memref<128x128xbf16, #tpu.memory_space<vmem>>, vector<128x128xbf16>,
    return
  }
  func.func @transform_0(%arg0: i32) -> (i32, i32) {
    %c0_i32 = arith.constant 0 : i32
    %c0_i32_0 = arith.constant 0 : i32
    return %arg0, %c0_i32 : i32, i32
  }
  func.func @transform_1(%arg0: i32) -> (i32, i32) {
    %c0_i32 = arith.constant 0 : i32
    %c0_i32_0 = arith.constant 0 : i32
    %c0_i32_1 = arith.constant 0 : i32
    return %c0_i32, %c0_i32_0 : i32, i32
  }
  func.func @transform_2(%arg0: i32) -> (i32, i32) {
    %c0_i32 = arith.constant 0 : i32
    %c0_i32_0 = arith.constant 0 : i32
    return %arg0, %c0_i32 : i32, i32
  }
}

module attributes {stable_mosaic.version = 11 : i64} {
  func.func @_agg_layer_kernel(%arg0: i32, %arg1: i32, %arg2: memref<128x256xbf16, #tpu.memory_space<vmem>>, %arg3: memref<256x128xbf16, #tpu.memory_space<vmem>>, %arg4: memref<128x128xf32, #tpu.memory_space<vmem>>, %arg5: memref<128x128xf32, #tpu.memory_space<vmem>>) attributes {dimension_semantics = [#tpu.dimension_semantics<parallel>, #tpu.dimension_semantics<arbitrary>], iteration_bounds = array<i64: 2, 1>, scalar_prefetch = 0 : i64, scratch_operands = 1 : i64, tpu.core_type = #tpu.core_type<tc>, window_params = [{transform_indices = @transform_0, window_bounds = array<i64: 128, 256>}, {transform_indices = @transform_1, window_bounds = array<i64: 256, 128>}, {transform_indices = @transform_2, window_bounds = array<i64: 128, 128>}]} {
    %c0_i32 = arith.constant 0 : i32
    %0 = arith.cmpi eq, %arg1, %c0_i32 : i32
    %1 = arith.extui %0 : i1 to i32
    %c0_i32_0 = arith.constant 0 : i32
    %2 = arith.cmpi ne, %1, %c0_i32_0 : i32
    scf.if %2 {
      %cst_10 = arith.constant 0.000000e+00 : f32
      %12 = vector.broadcast %cst_10 : f32 to vector<128x128xf32>
      %c0_11 = arith.constant 0 : index
      %c0_12 = arith.constant 0 : index
      %13 = vector.load %arg5[%c0_11, %c0_12] : memref<128x128xf32, #tpu.memory_space<vmem>>, vector<128x128xf32>
      tpu.vector_store %arg5[%c0_11, %c0_12], %12 {strides = array<i32>} : memref<128x128xf32, #tpu.memory_space<vmem>>, vector<128x128xf32>,
    } else {
    }
    %c0 = arith.constant 0 : index
    %c0_1 = arith.constant 0 : index
    %3 = vector.load %arg5[%c0, %c0_1] : memref<128x128xf32, #tpu.memory_space<vmem>>, vector<128x128xf32>
    %c0_2 = arith.constant 0 : index
    %c0_3 = arith.constant 0 : index
    %4 = vector.load %arg2[%c0_2, %c0_3] : memref<128x256xbf16, #tpu.memory_space<vmem>>, vector<128x256xbf16>
    %c0_4 = arith.constant 0 : index
    %c0_5 = arith.constant 0 : index
    %5 = vector.load %arg3[%c0_4, %c0_5] : memref<256x128xbf16, #tpu.memory_space<vmem>>, vector<256x128xbf16>
    %cst = arith.constant dense<0.000000e+00> : vector<128x128xf32>
    %6 = tpu.matmul %4, %5, %cst {dimension_numbers = #tpu.dot_dimension_numbers<[1], [0], [0], [1], [0, 0, 1, 1], [], []>} : vector<128x256xbf16>, vector<256x128xbf16>, vector<128x128xf32> -> vector<128x128xf32>
    %7 = arith.addf %3, %6 : vector<128x128xf32>
    %c0_6 = arith.constant 0 : index
    %c0_7 = arith.constant 0 : index
    %8 = vector.load %arg5[%c0_6, %c0_7] : memref<128x128xf32, #tpu.memory_space<vmem>>, vector<128x128xf32>
    tpu.vector_store %arg5[%c0_6, %c0_7], %7 {strides = array<i32>} : memref<128x128xf32, #tpu.memory_space<vmem>>, vector<128x128xf32>,
    %c0_i32_8 = arith.constant 0 : i32
    %9 = arith.cmpi eq, %arg1, %c0_i32_8 : i32
    %10 = arith.extui %9 : i1 to i32
    %c0_i32_9 = arith.constant 0 : i32
    %11 = arith.cmpi ne, %10, %c0_i32_9 : i32
    scf.if %11 {
      %c0_10 = arith.constant 0 : index
      %c0_11 = arith.constant 0 : index
      %12 = vector.load %arg5[%c0_10, %c0_11] : memref<128x128xf32, #tpu.memory_space<vmem>>, vector<128x128xf32>
      %c0_12 = arith.constant 0 : index
      %c0_13 = arith.constant 0 : index
      %13 = vector.load %arg4[%c0_12, %c0_13] : memref<128x128xf32, #tpu.memory_space<vmem>>, vector<128x128xf32>
      tpu.vector_store %arg4[%c0_12, %c0_13], %12 {strides = array<i32>} : memref<128x128xf32, #tpu.memory_space<vmem>>, vector<128x128xf32>,
    } else {
    }
    return
  }
  func.func @transform_0(%arg0: i32, %arg1: i32) -> (i32, i32) {
    %c0_i32 = arith.constant 0 : i32
    return %arg0, %arg1 : i32, i32
  }
  func.func @transform_1(%arg0: i32, %arg1: i32) -> (i32, i32) {
    %c0_i32 = arith.constant 0 : i32
    %c0_i32_0 = arith.constant 0 : i32
    return %arg1, %c0_i32 : i32, i32
  }
  func.func @transform_2(%arg0: i32, %arg1: i32) -> (i32, i32) {
    %c0_i32 = arith.constant 0 : i32
    %c0_i32_0 = arith.constant 0 : i32
    return %arg0, %c0_i32 : i32, i32
  }
}

</mosaic_0001>

<bundles_post_ra>
// kernel: net_gcn_forward.4
= control target key start
LH: loop header
LB: loop body
LE: loop exit
PB: predicated region body
PF: predicated region fallthrough
CT: control target
= control target key end

     0   :  { %s827_s9 = smov 0   ;;  %s940_s0 = inlined_call_operand.vmem [shape: bf16[256,256], index: 0, kind: input, shape index: {}]   ;;  %s941_s1 = inlined_call_operand.vmem [shape: bf16[256,128], index: 1, kind: input, shape index: {}]   ;;  %s942_s2 = inlined_call_operand.vmem [shape: bf16[256,128], index: 2, kind: output, shape index: {}]  }
   0x1 LB: > { %s560_s10 = sadd.s32 4294967295, %s810_s9   ;;  %p564_p0 = scmp.ge.s32.totalorder %s810_s9, 1  ;;  %s810_s9 = sphi %s827_s9, %s12_s9  }
   0x2   : > { %p114_p1 = scmp.lt.s32.totalorder %s810_s9, 3 }
   0x4   : > { %p115_p2 = pnand %p564_p0, %p114_p1 }
   0x5   : > { %s565_s23 = sshll.u32 (!%p115_p2), %s560_s10, 4 }
   0x6   : > { %118 = sbr.rel (%p115_p2) target bundleno = 237 (0xed), region = 28  ;;  %p138_p3 = scmp.lt.s32.totalorder (!%p115_p2), %s565_s23, 31 }
   0xb   : > { %v724_v0 = vld [vmem:[%s941_s1 + $0x38] sm:$0xff]  ;;  %v723_v2 = vld [vmem:[%s941_s1 + $0x30] sm:$0xff]  ;;  %v722_v4 = vld [vmem:[%s941_s1 + $0x28] sm:$0xff]  ;;  %s944_s23 = smov (!%p138_p3, %s565_s23), 31 }
   0xc   : > { %v732_v1 = vld [vmem:[%s941_s1 + $0x78] sm:$0xff]  ;;  %374 = vmatpush.bf16.msra.mxu0 %v724_v0  ;;  %780 = vmatpush.bf16.msra.mxu2 %v724_v0  ;;  %v731_v3 = vld [vmem:[%s941_s1 + $0x70] sm:$0xff]  ;;  %v730_v5 = vld [vmem:[%s941_s1 + $0x68] sm:$0xff]  ;;  %s700_s8 = sshll.u32 %s944_s23, 3  ;;  %s569_s21 = sshll.u32 %s944_s23, 2 }
   0xd   : > { %423 = vmatpush.bf16.msra.mxu1 %v732_v1  ;;  %788 = vmatpush.bf16.msra.mxu3 %v732_v1  ;;  %v721_v6 = vld [vmem:[%s941_s1 + $0x20] sm:$0xff]  ;;  %v720_v8 = vld [vmem:[%s941_s1 + $0x18] sm:$0xff]  ;;  %v719_v10 = vld [vmem:[%s941_s1 + $0x10] sm:$0xff]  ;;  %s880_s14 = scalar_lea.vmem %s940_s0, %s700_s8  ;;  %s927_s25 = scalar_lea.vmem %s942_s2, %s569_s21 }
   0xe   : > { %v729_v7 = vld [vmem:[%s941_s1 + $0x60] sm:$0xff]  ;;  %v728_v9 = vld [vmem:[%s941_s1 + $0x58] sm:$0xff]  ;;  %v727_v11 = vld [vmem:[%s941_s1 + $0x50] sm:$0xff] }
   0xf   : > { %v718_v12 = vld [vmem:[%s941_s1 + $0x8] sm:$0xff]  ;;  %v717_v14 = vld [vmem:[%s941_s1] sm:$0xff]  ;;  %v580_v28 = vld [vmem:[%s880_s14 + $0x10] sm:$0xf] }
  0x10   : > { %375 = vmatpush.bf16.msra.mxu0 %v723_v2  ;;  %781 = vmatpush.bf16.msra.mxu2 %v723_v2  ;;  %v726_v13 = vld [vmem:[%s941_s1 + $0x48] sm:$0xff]  ;;  %v725_v15 = vld [vmem:[%s941_s1 + $0x40] sm:$0xff]  ;;  %v704_v29 = vld [vmem:[%s880_s14 + $0x14] sm:$0xf0] }
  0x11   : > { %424 = vmatpush.bf16.msra.mxu1 %v731_v3  ;;  %789 = vmatpush.bf16.msra.mxu3 %v731_v3  ;;  %v572_v16 = vld [vmem:[%s880_s14] sm:$0xf]  ;;  %v702_v17 = vld [vmem:[%s880_s14 + $0x4] sm:$0xf0]  ;;  %v701_v20 = vld [vmem:[%s880_s14 + $0x4] sm:$0xf]  ;;  %v581_v36 = vor.u32 %v704_v29, %v580_v28 }
  0x12   : > { %v604_v18 = vld [vmem:[%s880_s14 + $0x40] sm:$0xf]  ;;  %v710_v19 = vld [vmem:[%s880_s14 + $0x44] sm:$0xf0]  ;;  %v574_v21 = vld [vmem:[%s880_s14 + $0x8] sm:$0xf0]  ;;  %v573_v24 = vor.u32 %v702_v17, %v572_v16 }
  0x13   : > { %v709_v22 = vld [vmem:[%s880_s14 + $0x44] sm:$0xf]  ;;  %v606_v23 = vld [vmem:[%s880_s14 + $0x48] sm:$0xf0]  ;;  %v605_v25 = vor.u32 %v710_v19, %v604_v18  ;;  %v577_v26 = vor.u32 %v701_v20, %v574_v21  ;;  %v612_v30 = vld [vmem:[%s880_s14 + $0x50] sm:$0xf] }
  0x14   : > { %376 = vmatpush.bf16.msra.mxu0 %v722_v4  ;;  %782 = vmatpush.bf16.msra.mxu2 %v722_v4  ;;  %v609_v27 = vor.u32 %v709_v22, %v606_v23  ;;  %v712_v31 = vld [vmem:[%s880_s14 + $0x54] sm:$0xf0]  ;;  %v703_v32 = vld [vmem:[%s880_s14 + $0x14] sm:$0xf]  ;;  %v582_v33 = vld [vmem:[%s880_s14 + $0x18] sm:$0xf0] }
  0x15   : > { %425 = vmatpush.bf16.msra.mxu1 %v730_v5  ;;  %790 = vmatpush.bf16.msra.mxu3 %v730_v5  ;;  %v711_v34 = vld [vmem:[%s880_s14 + $0x54] sm:$0xf]  ;;  %v614_v35 = vld [vmem:[%s880_s14 + $0x58] sm:$0xf0]  ;;  %v613_v37 = vor.u32 %v712_v31, %v612_v30  ;;  %v585_v38 = vor.u32 %v703_v32, %v582_v33  ;;  %v588_v40 = vld [vmem:[%s880_s14 + $0x20] sm:$0xf] }
  0x16   : > { %v617_v39 = vor.u32 %v711_v34, %v614_v35  ;;  %v706_v41 = vld [vmem:[%s880_s14 + $0x24] sm:$0xf0]  ;;  %v620_v42 = vld [vmem:[%s880_s14 + $0x60] sm:$0xf]  ;;  %v705_v44 = vld [vmem:[%s880_s14 + $0x24] sm:$0xf] }
  0x17   : > { %v714_v43 = vld [vmem:[%s880_s14 + $0x64] sm:$0xf0]  ;;  %v590_v45 = vld [vmem:[%s880_s14 + $0x28] sm:$0xf0]  ;;  %v713_v46 = vld [vmem:[%s880_s14 + $0x64] sm:$0xf]  ;;  %v589_v48 = vor.u32 %v706_v41, %v588_v40 }
  0x18   : > { %377 = vmatpush.bf16.msra.mxu0 %v721_v6  ;;  %783 = vmatpush.bf16.msra.mxu2 %v721_v6  ;;  %v622_v47 = vld [vmem:[%s880_s14 + $0x68] sm:$0xf0]  ;;  %v621_v49 = vor.u32 %v714_v43, %v620_v42  ;;  %v593_v50 = vor.u32 %v705_v44, %v590_v45  ;;  %v596_v52 = vld [vmem:[%s880_s14 + $0x30] sm:$0xf]  ;;  %v708_v53 = vld [vmem:[%s880_s14 + $0x34] sm:$0xf0] }
  0x19   : > { %426 = vmatpush.bf16.msra.mxu1 %v729_v7  ;;  %791 = vmatpush.bf16.msra.mxu3 %v729_v7  ;;  %v625_v51 = vor.u32 %v713_v46, %v622_v47  ;;  %v628_v54 = vld [vmem:[%s880_s14 + $0x70] sm:$0xf]  ;;  %v716_v55 = vld [vmem:[%s880_s14 + $0x74] sm:$0xf0]  ;;  %v707_v56 = vld [vmem:[%s880_s14 + $0x34] sm:$0xf]  ;;  %v597_v60 = vor.u32 %v708_v53, %v596_v52 }
  0x1a   : > { %v598_v57 = vld [vmem:[%s880_s14 + $0x38] sm:$0xf0]  ;;  %v715_v58 = vld [vmem:[%s880_s14 + $0x74] sm:$0xf]  ;;  %v629_v61 = vor.u32 %v716_v55, %v628_v54 }
  0x1b   : > { %v630_v59 = vld [vmem:[%s880_s14 + $0x78] sm:$0xf0]  ;;  %v601_v62 = vor.u32 %v707_v56, %v598_v57 }
  0x1c   : > { %378 = vmatpush.bf16.msra.mxu0 %v720_v8  ;;  %784 = vmatpush.bf16.msra.mxu2 %v720_v8  ;;  %v633_v63 = vor.u32 %v715_v58, %v630_v59 }
  0x1d   : > { %427 = vmatpush.bf16.msra.mxu1 %v728_v9  ;;  %792 = vmatpush.bf16.msra.mxu3 %v728_v9 }
  0x20   : > { %379 = vmatpush.bf16.msra.mxu0 %v719_v10  ;;  %785 = vmatpush.bf16.msra.mxu2 %v719_v10 }
  0x21   : > { %428 = vmatpush.bf16.msra.mxu1 %v727_v11  ;;  %793 = vmatpush.bf16.msra.mxu3 %v727_v11 }
  0x24   : > { %380 = vmatpush.bf16.msra.mxu0 %v718_v12  ;;  %786 = vmatpush.bf16.msra.mxu2 %v718_v12 }
  0x25   : > { %429 = vmatpush.bf16.msra.mxu1 %v726_v13  ;;  %794 = vmatpush.bf16.msra.mxu3 %v726_v13 }
  0x28   : > { %381 = vmatpush.bf16.msra.mxu0 %v717_v14  ;;  %787 = vmatpush.bf16.msra.mxu2 %v717_v14 }
  0x29   : > { %430 = vmatpush.bf16.msra.mxu1 %v725_v15  ;;  %795 = vmatpush.bf16.msra.mxu3 %v725_v15 }
  0x2b   : > { %382 = vmatmul.bf16.vlgmr.msra.gmra.mxu0 %v573_v24  ;;  %402 = vmatmul.bf16.vlgmr.msra.gmra.mxu2 %v605_v25 }
  0x2c   : > { %431 = vmatmul.bf16.vlgmr.msra.gmra.mxu1 %v577_v26  ;;  %451 = vmatmul.bf16.vlgmr.msra.gmra.mxu3 %v609_v27 }
  0x3b   : > { %387 = vmatmul.bf16.gmra.mxu0 %v581_v36  ;;  %407 = vmatmul.bf16.gmra.mxu2 %v613_v37 }
  0x3c   : > { %436 = vmatmul.bf16.gmra.mxu1 %v585_v38  ;;  %456 = vmatmul.bf16.gmra.mxu3 %v617_v39 }
  0x4b   : > { %392 = vmatmul.bf16.gmra.mxu0 %v589_v48  ;;  %412 = vmatmul.bf16.gmra.mxu2 %v621_v49 }
  0x4c   : > { %441 = vmatmul.bf16.gmra.mxu1 %v593_v50  ;;  %461 = vmatmul.bf16.gmra.mxu3 %v625_v51 }
  0x5b   : > { %397 = vmatmul.bf16.gmra.mxu0 %v597_v60  ;;  %417 = vmatmul.bf16.gmra.mxu2 %v629_v61 }
  0x5c   : > { %446 = vmatmul.bf16.gmra.mxu1 %v601_v62  ;;  %466 = vmatmul.bf16.gmra.mxu3 %v633_v63 }
  0xa8   : > { %v383_v0 = vpop.f32.mrf.mxu0 }
  0xa9   : > { %v432_v1 = vpop.f32.mrf.mxu1 }
  0xaa   : > { %v433_v6 = vadd.f32 %v432_v1, %v383_v0 }
  0xae   : > { %v403_v2 = vpop.f32.mrf.mxu2 }
  0xaf   : > { %v452_v3 = vpop.f32.mrf.mxu3 }
  0xb0   : > { %v385_v4 = vpop.f32.mrf.mxu0  ;;  %v453_v11 = vadd.f32 %v452_v3, %v403_v2 }
  0xb1   : > { %v434_v5 = vpop.f32.mrf.mxu1 }
  0xb2   : > { %v435_v7 = vadd.f32 %v434_v5, %v385_v4 }
  0xb4   : > { %v736_v8 = vpack.c.bf16 %v435_v7, %v433_v6 }
  0xb6   : > { %737 = vst [vmem:[%s927_s25] sm:$0xff] %v736_v8   ;;  %v405_v9 = vpop.f32.mrf.mxu2 }
  0xb7   : > { %v454_v10 = vpop.f32.mrf.mxu3 }
  0xb8   : > { %v455_v12 = vadd.f32 %v454_v10, %v405_v9  ;;  %v388_v13 = vpop.f32.mrf.mxu0 }
  0xb9   : > { %v437_v14 = vpop.f32.mrf.mxu1 }
  0xba   : > { %v756_v15 = vpack.c.bf16 %v455_v12, %v453_v11  ;;  %v438_v20 = vadd.f32 %v437_v14, %v388_v13 }
  0xbc   : > { %776 = vst [vmem:[%s927_s25 + $0x20] sm:$0xff] %v756_v15  }
  0xbe   : > { %v408_v16 = vpop.f32.mrf.mxu2 }
  0xbf   : > { %v457_v17 = vpop.f32.mrf.mxu3 }
  0xc0   : > { %v390_v18 = vpop.f32.mrf.mxu0  ;;  %v458_v25 = vadd.f32 %v457_v17, %v408_v16 }
  0xc1   : > { %v439_v19 = vpop.f32.mrf.mxu1 }
  0xc2   : > { %v440_v21 = vadd.f32 %v439_v19, %v390_v18 }
  0xc4   : > { %v741_v22 = vpack.c.bf16 %v440_v21, %v438_v20 }
  0xc6   : > { %773 = vst [vmem:[%s927_s25 + $0x8] sm:$0xff] %v741_v22   ;;  %v410_v23 = vpop.f32.mrf.mxu2 }
  0xc7   : > { %v459_v24 = vpop.f32.mrf.mxu3 }
  0xc8   : > { %v460_v26 = vadd.f32 %v459_v24, %v410_v23  ;;  %v393_v27 = vpop.f32.mrf.mxu0 }
  0xc9   : > { %v442_v28 = vpop.f32.mrf.mxu1 }
  0xca   : > { %v761_v29 = vpack.c.bf16 %v460_v26, %v458_v25  ;;  %v443_v34 = vadd.f32 %v442_v28, %v393_v27 }
  0xcc   : > { %777 = vst [vmem:[%s927_s25 + $0x28] sm:$0xff] %v761_v29  }
  0xce   : > { %v413_v30 = vpop.f32.mrf.mxu2 }
  0xcf   : > { %v462_v31 = vpop.f32.mrf.mxu3 }
  0xd0   : > { %v395_v32 = vpop.f32.mrf.mxu0  ;;  %v463_v39 = vadd.f32 %v462_v31, %v413_v30 }
  0xd1   : > { %v444_v33 = vpop.f32.mrf.mxu1 }
  0xd2   : > { %v445_v35 = vadd.f32 %v444_v33, %v395_v32 }
  0xd4   : > { %v746_v36 = vpack.c.bf16 %v445_v35, %v443_v34 }
  0xd6   : > { %774 = vst [vmem:[%s927_s25 + $0x10] sm:$0xff] %v746_v36   ;;  %v415_v37 = vpop.f32.mrf.mxu2 }
  0xd7   : > { %v464_v38 = vpop.f32.mrf.mxu3 }
  0xd8   : > { %v465_v40 = vadd.f32 %v464_v38, %v415_v37  ;;  %v398_v41 = vpop.f32.mrf.mxu0 }
  0xd9   : > { %v447_v42 = vpop.f32.mrf.mxu1 }
  0xda   : > { %v766_v43 = vpack.c.bf16 %v465_v40, %v463_v39  ;;  %v448_v48 = vadd.f32 %v447_v42, %v398_v41 }
  0xdc   : > { %778 = vst [vmem:[%s927_s25 + $0x30] sm:$0xff] %v766_v43  }
  0xde   : > { %v418_v44 = vpop.f32.mrf.mxu2 }
  0xdf   : > { %v467_v45 = vpop.f32.mrf.mxu3 }
  0xe0   : > { %v400_v46 = vpop.f32.mrf.mxu0  ;;  %v468_v53 = vadd.f32 %v467_v45, %v418_v44 }
  0xe1   : > { %v449_v47 = vpop.f32.mrf.mxu1 }
  0xe2   : > { %v450_v49 = vadd.f32 %v449_v47, %v400_v46 }
  0xe4   : > { %v751_v50 = vpack.c.bf16 %v450_v49, %v448_v48 }
  0xe6   : > { %775 = vst [vmem:[%s927_s25 + $0x18] sm:$0xff] %v751_v50   ;;  %v420_v51 = vpop.f32.mrf.mxu2 }
  0xe7   : > { %v469_v52 = vpop.f32.mrf.mxu3 }
  0xe8   : > { %v470_v54 = vadd.f32 %v469_v52, %v420_v51 }
  0xea   : > { %v771_v55 = vpack.c.bf16 %v470_v54, %v468_v53 }
  0xec   : > { %779 = vst [vmem:[%s927_s25 + $0x38] sm:$0xff] %v771_v55  }
  0xed PF: > { %s12_s9 = sadd.s32 1, %s810_s9  }
  0xee   : > { %p9_p4 = scmp.ge.s32.totalorder %s12_s9, 4  }
  0xf0   :  { %11 = sbr.rel (!%p9_p4) target bundleno = 1 (0x1), region = 58 }

// kernel: net_gcn_forward.5
= control target key start
LH: loop header
LB: loop body
LE: loop exit
PB: predicated region body
PF: predicated region fallthrough
CT: control target
= control target key end

     0   :  { %7 = vsyncpa [#allocation4], 0  ;;  %s1278_s0 = inlined_call_operand.vmem [shape: bf16[256,256], index: 0, kind: input, shape index: {}]   ;;  %s1279_s1 = inlined_call_operand.vmem [shape: bf16[256,128], index: 1, kind: input, shape index: {}]   ;;  %s1280_s2 = inlined_call_operand.hbm [shape: f32[256,128], index: 2, kind: output, shape index: {}]  }
   0x1   :  { %9 = vsyncpa [#allocation4 + $0x1], 0  ;;  %s1077_s9 = smov 0   ;;  %s1079_s10 = smov 0  }
   0x2   :  { %s1081_s11 = smov 0   ;;  %s1083_s12 = smov 0  }
   0x3   :  { %s1085_s13 = smov 0   ;;  %s1087_s14 = smov 0  }
   0x4 LB: > { %s730_s15 = sadd.s32 4294967295, %s1058_s14   ;;  %s731_s16 = sadd.s32 4294967294, %s1058_s14   ;;  %s1058_s14 = sphi %s1087_s14, %s15_s14   ;;  %s1054_s13 = sphi %s1085_s13, %s1287_s13   ;;  %s1050_s12 = sphi %s1083_s12, %s1286_s12   ;;  %s1046_s11 = sphi %s1081_s11, %s1285_s11   ;;  %s1042_s10 = sphi %s1079_s10, %s1284_s10   ;;  %s1038_s9 = sphi %s1077_s9, %s1283_s9  }
   0x5   : > { %s27_s17 = sadd.s32 1, %s1054_s13  ;;  %s88_s18 = sadd.s32 1, %s1046_s11 }
   0x6   : > { %p29_p0 = scmp.ge.s32.totalorder %s27_s17, 2  ;;  %p98_p1 = scmp.ne.s32.totalorder %s1046_s11, %s1042_s10 }
   0x7   : > { %p99_p2 = scmp.eq.s32.totalorder %s730_s15, 1  ;;  %p104_p3 = scmp.ne.s32.totalorder %s1042_s10, %s1038_s9 }
   0x8   : > { %s1289_s17 = smov (%p29_p0, %s27_s17), 0  ;;  %p105_p5 = scmp.eq.s32.totalorder %s731_s16, 1 }
   0x9   : > { %p1117_p4 = por %p99_p2, %p98_p1  ;;  %s85_s20 = ssub.s32 %s1054_s13, %s1289_s17 }
   0xa   : > { %p735_p6 = scmp.ge.s32.totalorder %s1058_s14, 1  ;;  %p86_p7 = scmp.eq.s32.totalorder %s85_s20, 0 }
   0xb   : > { %p1124_p8 = por %p105_p5, %p104_p3  ;;  %p147_p9 = scmp.lt.s32.totalorder %s1058_s14, 3 }
   0xc   : > { %s1130_s22 = scalar_select %p86_p7, %s1046_s11, %s88_s18  }
   0xd   : > { %p148_p10 = pnand %p735_p6, %p147_p9 }
   0xe   : > { %s737_s7 = sshll.u32 (!%p148_p10), %s1050_s12, 4  ;;  %s176_s24 = sand.u32 (!%p148_p10), 1, %s1042_s10  }
   0xf   : > { %151 = sbr.rel (%p148_p10) target bundleno = 247 (0xf7), region = 28  ;;  %p181_p11 = scmp.lt.s32.totalorder (!%p148_p10), %s737_s7, 31 }
  0x10   : > { %s736_s25 = sshll.u32 (!%p148_p10), %s176_s24, 7  ;;  %s906_s27 = sshll.u32 (!%p148_p10), %s1050_s12, 7 }
  0x11   : > { %s1221_s26 = scalar_lea.vmem (!%p148_p10), [#allocation3], %s736_s25  ;;  %s624_s12 = scalar_lea.sflag (!%p148_p10), [#allocation4], %s176_s24 }
  0x12   : > { %s636_s3 = sshll.u32 (!%p148_p10), %s1221_s26, 4  ;;  %s1000_s15 = scalar_lea.hbm (!%p148_p10), %s1280_s2, 256  ;;  %s637_s3 = int_to_ptr.vmem [resolvable:$true] %s636_s3 }
  0x14   : > { %v897_v0 = vld [vmem:[%s1279_s1 + $0x38] sm:$0xff]  ;;  %v896_v2 = vld [vmem:[%s1279_s1 + $0x30] sm:$0xff]  ;;  %v895_v4 = vld [vmem:[%s1279_s1 + $0x28] sm:$0xff]  ;;  %s1291_s7 = smov (!%p181_p11, %s737_s7), 31 }
  0x15   : > { %v905_v1 = vld [vmem:[%s1279_s1 + $0x78] sm:$0xff]  ;;  %458 = vmatpush.bf16.msra.mxu0 %v897_v0  ;;  %907 = vmatpush.bf16.msra.mxu2 %v897_v0  ;;  %v904_v3 = vld [vmem:[%s1279_s1 + $0x70] sm:$0xff]  ;;  %v903_v5 = vld [vmem:[%s1279_s1 + $0x68] sm:$0xff]  ;;  %s873_s30 = sshll.u32 %s1291_s7, 3 }
  0x16   : > { %507 = vmatpush.bf16.msra.mxu1 %v905_v1  ;;  %915 = vmatpush.bf16.msra.mxu3 %v905_v1  ;;  %v894_v6 = vld [vmem:[%s1279_s1 + $0x20] sm:$0xff]  ;;  %v893_v8 = vld [vmem:[%s1279_s1 + $0x18] sm:$0xff]  ;;  %v892_v10 = vld [vmem:[%s1279_s1 + $0x10] sm:$0xff]  ;;  %s1175_s8 = scalar_lea.vmem %s1278_s0, %s873_s30  ;;  %s635_s30 = scalar_lea.hbm %s1280_s2, %s906_s27 }
  0x17   : > { %v902_v7 = vld [vmem:[%s1279_s1 + $0x60] sm:$0xff]  ;;  %v901_v9 = vld [vmem:[%s1279_s1 + $0x58] sm:$0xff]  ;;  %v900_v11 = vld [vmem:[%s1279_s1 + $0x50] sm:$0xff]  ;;  %s638_s4 = sshll.u32 %s635_s30, 4  ;;  %s639_s4 = int_to_ptr.hbm [resolvable:$true] %s638_s4 }
  0x18   : > { %v891_v12 = vld [vmem:[%s1279_s1 + $0x8] sm:$0xff]  ;;  %v890_v14 = vld [vmem:[%s1279_s1] sm:$0xff]  ;;  %v750_v28 = vld [vmem:[%s1175_s8 + $0x10] sm:$0xf]  ;;  %s994_s5 = sshra.s32 %s639_s4, 4  ;;  %s995_s5 = int_to_ptr.hbm [resolvable:$true] %s994_s5 }
  0x19   : > { %459 = vmatpush.bf16.msra.mxu0 %v896_v2  ;;  %908 = vmatpush.bf16.msra.mxu2 %v896_v2  ;;  %v899_v13 = vld [vmem:[%s1279_s1 + $0x48] sm:$0xff]  ;;  %v898_v15 = vld [vmem:[%s1279_s1 + $0x40] sm:$0xff]  ;;  %v877_v29 = vld [vmem:[%s1175_s8 + $0x14] sm:$0xf0]  ;;  %s996_s6 = scalar_lea.hbm %s995_s5, 128  ;;  %p1001_p1 = scmp.lt.s32.totalorder %s995_s5, %s1280_s2 }
  0x1a   : > { %508 = vmatpush.bf16.msra.mxu1 %v904_v3  ;;  %916 = vmatpush.bf16.msra.mxu3 %v904_v3  ;;  %v742_v16 = vld [vmem:[%s1175_s8] sm:$0xf]  ;;  %v875_v17 = vld [vmem:[%s1175_s8 + $0x4] sm:$0xf0]  ;;  %v874_v20 = vld [vmem:[%s1175_s8 + $0x4] sm:$0xf]  ;;  %v751_v36 = vor.u32 %v877_v29, %v750_v28  ;;  %p997_p12 = scmp.ne.s32.totalorder %s995_s5, %s996_s6  ;;  %p1002_p2 = scmp.lt.s32.totalorder %s1000_s15, %s996_s6 }
  0x1b   : > { %v774_v18 = vld [vmem:[%s1175_s8 + $0x40] sm:$0xf]  ;;  %v883_v19 = vld [vmem:[%s1175_s8 + $0x44] sm:$0xf0]  ;;  %v744_v21 = vld [vmem:[%s1175_s8 + $0x8] sm:$0xf0]  ;;  %v743_v24 = vor.u32 %v875_v17, %v742_v16 }
  0x1c   : > { %v882_v22 = vld [vmem:[%s1175_s8 + $0x44] sm:$0xf]  ;;  %v776_v23 = vld [vmem:[%s1175_s8 + $0x48] sm:$0xf0]  ;;  %v775_v25 = vor.u32 %v883_v19, %v774_v18  ;;  %v747_v26 = vor.u32 %v874_v20, %v744_v21  ;;  %v782_v30 = vld [vmem:[%s1175_s8 + $0x50] sm:$0xf]  ;;  %p998_p13 = pnand %p997_p12, %p1117_p4  ;;  %p1003_p3 = por %p1002_p2, %p1001_p1 }
  0x1d   : > { %460 = vmatpush.bf16.msra.mxu0 %v895_v4  ;;  %909 = vmatpush.bf16.msra.mxu2 %v895_v4  ;;  %v779_v27 = vor.u32 %v882_v22, %v776_v23  ;;  %v885_v31 = vld [vmem:[%s1175_s8 + $0x54] sm:$0xf0]  ;;  %v876_v32 = vld [vmem:[%s1175_s8 + $0x14] sm:$0xf]  ;;  %v752_v33 = vld [vmem:[%s1175_s8 + $0x18] sm:$0xf0] }
  0x1e   : > { %509 = vmatpush.bf16.msra.mxu1 %v903_v5  ;;  %917 = vmatpush.bf16.msra.mxu3 %v903_v5  ;;  %v884_v34 = vld [vmem:[%s1175_s8 + $0x54] sm:$0xf]  ;;  %v784_v35 = vld [vmem:[%s1175_s8 + $0x58] sm:$0xf0]  ;;  %v783_v37 = vor.u32 %v885_v31, %v782_v30  ;;  %v755_v38 = vor.u32 %v876_v32, %v752_v33  ;;  %v758_v40 = vld [vmem:[%s1175_s8 + $0x20] sm:$0xf]  ;;  %p999_p0 = pneg %p998_p13 }
  0x1f   : > { %v787_v39 = vor.u32 %v884_v34, %v784_v35  ;;  %v879_v41 = vld [vmem:[%s1175_s8 + $0x24] sm:$0xf0]  ;;  %v790_v42 = vld [vmem:[%s1175_s8 + $0x60] sm:$0xf]  ;;  %v878_v44 = vld [vmem:[%s1175_s8 + $0x24] sm:$0xf] }
  0x20   : > { %v887_v43 = vld [vmem:[%s1175_s8 + $0x64] sm:$0xf0]  ;;  %v760_v45 = vld [vmem:[%s1175_s8 + $0x28] sm:$0xf0]  ;;  %v886_v46 = vld [vmem:[%s1175_s8 + $0x64] sm:$0xf]  ;;  %v759_v48 = vor.u32 %v879_v41, %v758_v40  ;;  %p1004_p5 = pnand %p1003_p3, %p999_p0 }
  0x21   : > { %461 = vmatpush.bf16.msra.mxu0 %v894_v6  ;;  %910 = vmatpush.bf16.msra.mxu2 %v894_v6  ;;  %v792_v47 = vld [vmem:[%s1175_s8 + $0x68] sm:$0xf0]  ;;  %v791_v49 = vor.u32 %v887_v43, %v790_v42  ;;  %v763_v50 = vor.u32 %v878_v44, %v760_v45  ;;  %v766_v52 = vld [vmem:[%s1175_s8 + $0x30] sm:$0xf]  ;;  %v881_v53 = vld [vmem:[%s1175_s8 + $0x34] sm:$0xf0] }
  0x22   : > { %510 = vmatpush.bf16.msra.mxu1 %v902_v7  ;;  %918 = vmatpush.bf16.msra.mxu3 %v902_v7  ;;  %v795_v51 = vor.u32 %v886_v46, %v792_v47  ;;  %v798_v54 = vld [vmem:[%s1175_s8 + $0x70] sm:$0xf]  ;;  %v889_v55 = vld [vmem:[%s1175_s8 + $0x74] sm:$0xf0]  ;;  %v880_v56 = vld [vmem:[%s1175_s8 + $0x34] sm:$0xf]  ;;  %v767_v60 = vor.u32 %v881_v53, %v766_v52 }
  0x23   : > { %v768_v57 = vld [vmem:[%s1175_s8 + $0x38] sm:$0xf0]  ;;  %v888_v58 = vld [vmem:[%s1175_s8 + $0x74] sm:$0xf]  ;;  %v799_v61 = vor.u32 %v889_v55, %v798_v54 }
  0x24   : > { %v800_v59 = vld [vmem:[%s1175_s8 + $0x78] sm:$0xf0]  ;;  %v771_v62 = vor.u32 %v880_v56, %v768_v57 }
  0x25   : > { %462 = vmatpush.bf16.msra.mxu0 %v893_v8  ;;  %911 = vmatpush.bf16.msra.mxu2 %v893_v8  ;;  %v803_v63 = vor.u32 %v888_v58, %v800_v59 }
  0x26   : > { %511 = vmatpush.bf16.msra.mxu1 %v901_v9  ;;  %919 = vmatpush.bf16.msra.mxu3 %v901_v9 }
  0x29   : > { %463 = vmatpush.bf16.msra.mxu0 %v892_v10  ;;  %912 = vmatpush.bf16.msra.mxu2 %v892_v10 }
  0x2a   : > { %512 = vmatpush.bf16.msra.mxu1 %v900_v11  ;;  %920 = vmatpush.bf16.msra.mxu3 %v900_v11 }
  0x2d   : > { %464 = vmatpush.bf16.msra.mxu0 %v891_v12  ;;  %913 = vmatpush.bf16.msra.mxu2 %v891_v12 }
  0x2e   : > { %513 = vmatpush.bf16.msra.mxu1 %v899_v13  ;;  %921 = vmatpush.bf16.msra.mxu3 %v899_v13 }
  0x31   : > { %465 = vmatpush.bf16.msra.mxu0 %v890_v14  ;;  %914 = vmatpush.bf16.msra.mxu2 %v890_v14 }
  0x32   : > { %514 = vmatpush.bf16.msra.mxu1 %v898_v15  ;;  %922 = vmatpush.bf16.msra.mxu3 %v898_v15 }
  0x34   : > { %466 = vmatmul.bf16.vlgmr.msra.gmra.mxu0 %v743_v24  ;;  %486 = vmatmul.bf16.vlgmr.msra.gmra.mxu2 %v775_v25 }
  0x35   : > { %515 = vmatmul.bf16.vlgmr.msra.gmra.mxu1 %v747_v26  ;;  %535 = vmatmul.bf16.vlgmr.msra.gmra.mxu3 %v779_v27 }
  0x44   : > { %471 = vmatmul.bf16.gmra.mxu0 %v751_v36  ;;  %491 = vmatmul.bf16.gmra.mxu2 %v783_v37 }
  0x45   : > { %520 = vmatmul.bf16.gmra.mxu1 %v755_v38  ;;  %540 = vmatmul.bf16.gmra.mxu3 %v787_v39 }
  0x54   : > { %476 = vmatmul.bf16.gmra.mxu0 %v759_v48  ;;  %496 = vmatmul.bf16.gmra.mxu2 %v791_v49 }
  0x55   : > { %525 = vmatmul.bf16.gmra.mxu1 %v763_v50  ;;  %545 = vmatmul.bf16.gmra.mxu3 %v795_v51 }
  0x64   : > { %481 = vmatmul.bf16.gmra.mxu0 %v767_v60  ;;  %501 = vmatmul.bf16.gmra.mxu2 %v799_v61 }
  0x65   : > { %530 = vmatmul.bf16.gmra.mxu1 %v771_v62  ;;  %550 = vmatmul.bf16.gmra.mxu3 %v803_v63 }
  0xb1   : > { %v467_v0 = vpop.f32.mrf.mxu0 }
  0xb2   : > { %v516_v1 = vpop.f32.mrf.mxu1 }
  0xb3   : > { %v517_v2 = vadd.f32 %v516_v1, %v467_v0 }
  0xb5   : > { %607 = vst [vmem:[%s1221_s26] sm:$0xff] %v517_v2 }
  0xb7   : > { %v487_v3 = vpop.f32.mrf.mxu2 }
  0xb8   : > { %v536_v4 = vpop.f32.mrf.mxu3 }
  0xb9   : > { %v537_v5 = vadd.f32 %v536_v4, %v487_v3  ;;  %v469_v6 = vpop.f32.mrf.mxu0 }
  0xba   : > { %v518_v7 = vpop.f32.mrf.mxu1 }
  0xbb   : > { %615 = vst [vmem:[%s1221_s26 + $0x40] sm:$0xff] %v537_v5  ;;  %v519_v8 = vadd.f32 %v518_v7, %v469_v6 }
  0xbd   : > { %608 = vst [vmem:[%s1221_s26 + $0x8] sm:$0xff] %v519_v8 }
  0xbf   : > { %v489_v9 = vpop.f32.mrf.mxu2 }
  0xc0   : > { %v538_v10 = vpop.f32.mrf.mxu3 }
  0xc1   : > { %v539_v11 = vadd.f32 %v538_v10, %v489_v9  ;;  %v472_v12 = vpop.f32.mrf.mxu0 }
  0xc2   : > { %v521_v13 = vpop.f32.mrf.mxu1 }
  0xc3   : > { %616 = vst [vmem:[%s1221_s26 + $0x48] sm:$0xff] %v539_v11  ;;  %v522_v14 = vadd.f32 %v521_v13, %v472_v12 }
  0xc5   : > { %609 = vst [vmem:[%s1221_s26 + $0x10] sm:$0xff] %v522_v14 }
  0xc7   : > { %v492_v15 = vpop.f32.mrf.mxu2 }
  0xc8   : > { %v541_v16 = vpop.f32.mrf.mxu3 }
  0xc9   : > { %v542_v17 = vadd.f32 %v541_v16, %v492_v15  ;;  %v474_v18 = vpop.f32.mrf.mxu0 }
  0xca   : > { %v523_v19 = vpop.f32.mrf.mxu1 }
  0xcb   : > { %617 = vst [vmem:[%s1221_s26 + $0x50] sm:$0xff] %v542_v17  ;;  %v524_v20 = vadd.f32 %v523_v19, %v474_v18 }
  0xcd   : > { %610 = vst [vmem:[%s1221_s26 + $0x18] sm:$0xff] %v524_v20 }
  0xcf   : > { %v494_v21 = vpop.f32.mrf.mxu2 }
  0xd0   : > { %v543_v22 = vpop.f32.mrf.mxu3 }
  0xd1   : > { %v544_v23 = vadd.f32 %v543_v22, %v494_v21  ;;  %v477_v24 = vpop.f32.mrf.mxu0 }
  0xd2   : > { %v526_v25 = vpop.f32.mrf.mxu1 }
  0xd3   : > { %618 = vst [vmem:[%s1221_s26 + $0x58] sm:$0xff] %v544_v23  ;;  %v527_v26 = vadd.f32 %v526_v25, %v477_v24 }
  0xd5   : > { %611 = vst [vmem:[%s1221_s26 + $0x20] sm:$0xff] %v527_v26 }
  0xd7   : > { %v497_v27 = vpop.f32.mrf.mxu2 }
  0xd8   : > { %v546_v28 = vpop.f32.mrf.mxu3 }
  0xd9   : > { %v547_v29 = vadd.f32 %v546_v28, %v497_v27  ;;  %v479_v30 = vpop.f32.mrf.mxu0 }
  0xda   : > { %v528_v31 = vpop.f32.mrf.mxu1 }
  0xdb   : > { %619 = vst [vmem:[%s1221_s26 + $0x60] sm:$0xff] %v547_v29  ;;  %v529_v32 = vadd.f32 %v528_v31, %v479_v30 }
  0xdd   : > { %612 = vst [vmem:[%s1221_s26 + $0x28] sm:$0xff] %v529_v32 }
  0xdf   : > { %v499_v33 = vpop.f32.mrf.mxu2 }
  0xe0   : > { %v548_v34 = vpop.f32.mrf.mxu3 }
  0xe1   : > { %v549_v35 = vadd.f32 %v548_v34, %v499_v33  ;;  %v482_v36 = vpop.f32.mrf.mxu0 }
  0xe2   : > { %v531_v37 = vpop.f32.mrf.mxu1 }
  0xe3   : > { %620 = vst [vmem:[%s1221_s26 + $0x68] sm:$0xff] %v549_v35  ;;  %v532_v38 = vadd.f32 %v531_v37, %v482_v36 }
  0xe5   : > { %613 = vst [vmem:[%s1221_s26 + $0x30] sm:$0xff] %v532_v38 }
  0xe7   : > { %v502_v39 = vpop.f32.mrf.mxu2 }
  0xe8   : > { %v551_v40 = vpop.f32.mrf.mxu3 }
  0xe9   : > { %v552_v41 = vadd.f32 %v551_v40, %v502_v39  ;;  %v484_v42 = vpop.f32.mrf.mxu0 }
  0xea   : > { %v533_v43 = vpop.f32.mrf.mxu1 }
  0xeb   : > { %621 = vst [vmem:[%s1221_s26 + $0x70] sm:$0xff] %v552_v41  ;;  %v534_v44 = vadd.f32 %v533_v43, %v484_v42 }
  0xed   : > { %614 = vst [vmem:[%s1221_s26 + $0x38] sm:$0xff] %v534_v44 }
  0xef   : > { %v504_v45 = vpop.f32.mrf.mxu2 }
  0xf0   : > { %v553_v46 = vpop.f32.mrf.mxu3 }
  0xf1   : > { %v554_v47 = vadd.f32 %v553_v46, %v504_v45 }
  0xf3   : > { %622 = vst [vmem:[%s1221_s26 + $0x78] sm:$0xff] %v554_v47 }
  0xf4   : > { %1007 = shalt.err (!%p1004_p5)
}
  0xf5   : > { %s1060_s20 = smov 128   ;;  %s1061_s23 = smov 8  }
  0xf6   : > { %923 = dma.vmem_to_hbm [thread:$0]  (%p1117_p4), %s637_s3, 2048, %s639_s4, %s624_s12, %s1060_s20, %s1060_s20, %s1061_s23  }
  0xf7 PF: > { %p929_p6 = scmp.ge.s32.totalorder %s1058_s14, 2  ;;  %s653_s24 = sand.u32 1, %s1038_s9  }
  0xf8   : > { %s654_s25 = scalar_lea.sflag [#allocation4], %s653_s24 }
  0xf9   : > { %p926_p7 = pnand %p929_p6, %p1124_p8 }
  0xfb   : > { %p927_p9 = pneg %p926_p7 }
  0xfd   : > { %1033 = dma.done.wait (%p927_p9), %s654_s25, 2048  }
  0xfe   : > { %1035 = vsyncadd (%p927_p9), %s654_s25, 4294965248  ;;  %s15_s14 = sadd.s32 1, %s1058_s14   ;;  %s1283_s9 = smov %s1042_s10 }
  0xff   : > { %p12_p10 = scmp.ge.s32.totalorder %s15_s14, 4   ;;  %s1284_s10 = smov %s1046_s11 }
 0x100   : > { %s1285_s11 = smov %s1130_s22  ;;  %s1286_s12 = smov %s1054_s13 }
 0x101   : > { %s1287_s13 = smov %s1289_s17  ;;  %14 = sbr.rel (!%p12_p10) target bundleno = 4 (0x4), region = 74 }
 0x106   :  { %660 = vsyncpa [#allocation4], 1 }
 0x107   :  { %662 = vsyncpa [#allocation4 + $0x1], 1 }

// kernel: net_gcn_forward.3
= control target key start
LH: loop header
LB: loop body
LE: loop exit
PB: predicated region body
PF: predicated region fallthrough
CT: control target
= control target key end

     0   :  { %s1316_s12 = smov 0   ;;  %s1318_s13 = smov 0   ;;  %s1555_s0 = inlined_call_operand.vmem [shape: bf16[256,256], index: 0, kind: input, shape index: {}]   ;;  %s1556_s1 = inlined_call_operand.vmem [shape: bf16[256,128], index: 1, kind: input, shape index: {}]   ;;  %s1557_s2 = inlined_call_operand.vmem [shape: bf16[128,256], index: 2, kind: input, shape index: {}]   ;;  %s1558_s3 = inlined_call_operand.vmem [shape: bf16[256,256], index: 3, kind: output, shape index: {}]  }
   0x1   :  { %s1320_s14 = smov 0  }
   0x2 LB: > { %s25_s15 = sadd.s32 1, %s1290_s13  ;;  %p997_p0 = scmp.ge.s32.totalorder %s1294_s14, 1  ;;  %s1294_s14 = sphi %s1320_s14, %s13_s14   ;;  %s1290_s13 = sphi %s1318_s13, %s1560_s13   ;;  %s1286_s12 = sphi %s1316_s12, %s1559_s12  }
   0x3   : > { %p27_p1 = scmp.ge.s32.totalorder %s25_s15, 2  ;;  %p169_p2 = scmp.lt.s32.totalorder %s1294_s14, 3 }
   0x5   : > { %s1562_s15 = smov (%p27_p1, %s25_s15), 0  ;;  %p170_p3 = pnand %p997_p0, %p169_p2 }
   0x6   : > { %s998_s28 = sshll.u32 (!%p170_p3), %s1286_s12, 4 }
   0x7   : > { %173 = sbr.rel (%p170_p3) target bundleno = 440 (0x1b8), region = 32  ;;  %p206_p4 = scmp.lt.s32.totalorder (!%p170_p3), %s998_s28, 31 }
   0xc   : > { %v1223_v0 = vld [vmem:[%s1556_s1 + $0x38] sm:$0xff]  ;;  %v1222_v2 = vld [vmem:[%s1556_s1 + $0x30] sm:$0xff]  ;;  %v1221_v4 = vld [vmem:[%s1556_s1 + $0x28] sm:$0xff]  ;;  %s1564_s28 = smov (!%p206_p4, %s998_s28), 31 }
   0xd   : > { %v1231_v1 = vld [vmem:[%s1556_s1 + $0x78] sm:$0xff]  ;;  %489 = vmatpush.bf16.msra.mxu0 %v1223_v0  ;;  %v1230_v3 = vld [vmem:[%s1556_s1 + $0x70] sm:$0xff]  ;;  %v1229_v5 = vld [vmem:[%s1556_s1 + $0x68] sm:$0xff]  ;;  %s1198_s17 = sshll.u32 %s1564_s28, 3 }
   0xe   : > { %538 = vmatpush.bf16.msra.mxu1 %v1231_v1  ;;  %v1220_v6 = vld [vmem:[%s1556_s1 + $0x20] sm:$0xff]  ;;  %v1219_v8 = vld [vmem:[%s1556_s1 + $0x18] sm:$0xff]  ;;  %v1218_v10 = vld [vmem:[%s1556_s1 + $0x10] sm:$0xff]  ;;  %s1387_s24 = scalar_lea.vmem %s1555_s0, %s1198_s17  ;;  %s1528_s5 = scalar_lea.vmem %s1558_s3, %s1198_s17 }
   0xf   : > { %v1228_v7 = vld [vmem:[%s1556_s1 + $0x60] sm:$0xff]  ;;  %v1227_v9 = vld [vmem:[%s1556_s1 + $0x58] sm:$0xff]  ;;  %v1226_v11 = vld [vmem:[%s1556_s1 + $0x50] sm:$0xff] }
  0x10   : > { %v1217_v12 = vld [vmem:[%s1556_s1 + $0x8] sm:$0xff]  ;;  %v1216_v14 = vld [vmem:[%s1556_s1] sm:$0xff]  ;;  %v1014_v22 = vld [vmem:[%s1387_s24 + $0x10] sm:$0xf] }
  0x11   : > { %490 = vmatpush.bf16.msra.mxu0 %v1222_v2  ;;  %v1225_v13 = vld [vmem:[%s1556_s1 + $0x48] sm:$0xff]  ;;  %v1224_v15 = vld [vmem:[%s1556_s1 + $0x40] sm:$0xff]  ;;  %v1203_v23 = vld [vmem:[%s1387_s24 + $0x14] sm:$0xf0] }
  0x12   : > { %539 = vmatpush.bf16.msra.mxu1 %v1230_v3  ;;  %v1006_v16 = vld [vmem:[%s1387_s24] sm:$0xf]  ;;  %v1201_v17 = vld [vmem:[%s1387_s24 + $0x4] sm:$0xf0]  ;;  %v1200_v18 = vld [vmem:[%s1387_s24 + $0x4] sm:$0xf]  ;;  %v1015_v26 = vor.u32 %v1203_v23, %v1014_v22 }
  0x13   : > { %v1008_v19 = vld [vmem:[%s1387_s24 + $0x8] sm:$0xf0]  ;;  %v1007_v20 = vor.u32 %v1201_v17, %v1006_v16  ;;  %v1202_v24 = vld [vmem:[%s1387_s24 + $0x14] sm:$0xf]  ;;  %v1016_v25 = vld [vmem:[%s1387_s24 + $0x18] sm:$0xf0] }
  0x14   : > { %v1011_v21 = vor.u32 %v1200_v18, %v1008_v19  ;;  %v1019_v27 = vor.u32 %v1202_v24, %v1016_v25  ;;  %v1022_v28 = vld [vmem:[%s1387_s24 + $0x20] sm:$0xf]  ;;  %v1205_v29 = vld [vmem:[%s1387_s24 + $0x24] sm:$0xf0]  ;;  %v1204_v30 = vld [vmem:[%s1387_s24 + $0x24] sm:$0xf] }
  0x15   : > { %491 = vmatpush.bf16.msra.mxu0 %v1221_v4  ;;  %v1024_v31 = vld [vmem:[%s1387_s24 + $0x28] sm:$0xf0]  ;;  %v1023_v32 = vor.u32 %v1205_v29, %v1022_v28  ;;  %v1030_v34 = vld [vmem:[%s1387_s24 + $0x30] sm:$0xf]  ;;  %v1207_v35 = vld [vmem:[%s1387_s24 + $0x34] sm:$0xf0] }
  0x16   : > { %540 = vmatpush.bf16.msra.mxu1 %v1229_v5  ;;  %v1027_v33 = vor.u32 %v1204_v30, %v1024_v31  ;;  %v1206_v36 = vld [vmem:[%s1387_s24 + $0x34] sm:$0xf]  ;;  %v1032_v37 = vld [vmem:[%s1387_s24 + $0x38] sm:$0xf0]  ;;  %v1031_v38 = vor.u32 %v1207_v35, %v1030_v34  ;;  %v1038_v40 = vld [vmem:[%s1387_s24 + $0x40] sm:$0xf] }
  0x17   : > { %v1035_v39 = vor.u32 %v1206_v36, %v1032_v37  ;;  %v1209_v41 = vld [vmem:[%s1387_s24 + $0x44] sm:$0xf0]  ;;  %v1208_v42 = vld [vmem:[%s1387_s24 + $0x44] sm:$0xf]  ;;  %v1040_v43 = vld [vmem:[%s1387_s24 + $0x48] sm:$0xf0] }
  0x18   : > { %v1039_v44 = vor.u32 %v1209_v41, %v1038_v40  ;;  %v1043_v45 = vor.u32 %v1208_v42, %v1040_v43  ;;  %v1190_v46 = vld [vmem:[%s1557_s2 + $0x70] sm:$0xf]  ;;  %v1247_v47 = vld [vmem:[%s1557_s2 + $0x74] sm:$0xf0]  ;;  %v1246_v48 = vld [vmem:[%s1557_s2 + $0x74] sm:$0xf] }
  0x19   : > { %492 = vmatpush.bf16.msra.mxu0 %v1220_v6  ;;  %v1191_v49 = vor.u32 %v1247_v47, %v1190_v46  ;;  %v1192_v50 = vld [vmem:[%s1557_s2 + $0x78] sm:$0xf0]  ;;  %v1182_v51 = vld [vmem:[%s1557_s2 + $0x60] sm:$0xf]  ;;  %v1245_v52 = vld [vmem:[%s1557_s2 + $0x64] sm:$0xf0] }
  0x1a   : > { %541 = vmatpush.bf16.msra.mxu1 %v1228_v7  ;;  %v1195_v53 = vor.u32 %v1246_v48, %v1192_v50  ;;  %v1244_v54 = vld [vmem:[%s1557_s2 + $0x64] sm:$0xf]  ;;  %v1184_v55 = vld [vmem:[%s1557_s2 + $0x68] sm:$0xf0]  ;;  %v1183_v56 = vor.u32 %v1245_v52, %v1182_v51  ;;  %v1046_v58 = vld [vmem:[%s1387_s24 + $0x50] sm:$0xf] }
  0x1b   : > { %742 = vmatpush.bf16.msra.mxu2 %v1191_v49  ;;  %v1187_v57 = vor.u32 %v1244_v54, %v1184_v55  ;;  %v1211_v59 = vld [vmem:[%s1387_s24 + $0x54] sm:$0xf0]  ;;  %v1210_v60 = vld [vmem:[%s1387_s24 + $0x54] sm:$0xf]  ;;  %v1048_v61 = vld [vmem:[%s1387_s24 + $0x58] sm:$0xf0] }
  0x1c   : > { %791 = vmatpush.bf16.msra.mxu3 %v1195_v53  ;;  %v1047_v62 = vor.u32 %v1211_v59, %v1046_v58  ;;  %v1051_v63 = vor.u32 %v1210_v60, %v1048_v61  ;;  %v1174_v0 = vld [vmem:[%s1557_s2 + $0x50] sm:$0xf]  ;;  %v1243_v1 = vld [vmem:[%s1557_s2 + $0x54] sm:$0xf0]  ;;  %v1242_v2 = vld [vmem:[%s1557_s2 + $0x54] sm:$0xf] }
  0x1d   : > { %493 = vmatpush.bf16.msra.mxu0 %v1219_v8  ;;  %v1175_v3 = vor.u32 %v1243_v1, %v1174_v0  ;;  %v1176_v4 = vld [vmem:[%s1557_s2 + $0x58] sm:$0xf0]  ;;  %v1166_v5 = vld [vmem:[%s1557_s2 + $0x40] sm:$0xf]  ;;  %v1241_v6 = vld [vmem:[%s1557_s2 + $0x44] sm:$0xf0] }
  0x1e   : > { %542 = vmatpush.bf16.msra.mxu1 %v1227_v9  ;;  %v1179_v7 = vor.u32 %v1242_v2, %v1176_v4  ;;  %v1240_v8 = vld [vmem:[%s1557_s2 + $0x44] sm:$0xf]  ;;  %v1168_v9 = vld [vmem:[%s1557_s2 + $0x48] sm:$0xf0]  ;;  %v1054_v17 = vld [vmem:[%s1387_s24 + $0x60] sm:$0xf] }
  0x1f   : > { %743 = vmatpush.bf16.msra.mxu2 %v1183_v56  ;;  %v1213_v19 = vld [vmem:[%s1387_s24 + $0x64] sm:$0xf0]  ;;  %v1150_v24 = vld [vmem:[%s1557_s2 + $0x20] sm:$0xf]  ;;  %v1152_v28 = vld [vmem:[%s1557_s2 + $0x28] sm:$0xf0] }
  0x20   : > { %792 = vmatpush.bf16.msra.mxu3 %v1187_v57  ;;  %v1055_v22 = vor.u32 %v1213_v19, %v1054_v17  ;;  %v1237_v25 = vld [vmem:[%s1557_s2 + $0x24] sm:$0xf0]  ;;  %v1142_v30 = vld [vmem:[%s1557_s2 + $0x10] sm:$0xf]  ;;  %v1235_v31 = vld [vmem:[%s1557_s2 + $0x14] sm:$0xf0] }
  0x21   : > { %494 = vmatpush.bf16.msra.mxu0 %v1218_v10  ;;  %v1167_v10 = vor.u32 %v1241_v6, %v1166_v5  ;;  %v1144_v34 = vld [vmem:[%s1557_s2 + $0x18] sm:$0xf0]  ;;  %v1134_v36 = vld [vmem:[%s1557_s2] sm:$0xf]  ;;  %v1233_v37 = vld [vmem:[%s1557_s2 + $0x4] sm:$0xf0] }
  0x22   : > { %543 = vmatpush.bf16.msra.mxu1 %v1226_v11  ;;  %v1171_v11 = vor.u32 %v1240_v8, %v1168_v9  ;;  %v1136_v40 = vld [vmem:[%s1557_s2 + $0x8] sm:$0xf0]  ;;  %v1062_v42 = vld [vmem:[%s1387_s24 + $0x70] sm:$0xf]  ;;  %v1215_v43 = vld [vmem:[%s1387_s24 + $0x74] sm:$0xf0] }
  0x23   : > { %744 = vmatpush.bf16.msra.mxu2 %v1175_v3  ;;  %v1063_v46 = vor.u32 %v1215_v43, %v1062_v42 }
  0x24   : > { %793 = vmatpush.bf16.msra.mxu3 %v1179_v7 }
  0x25   : > { %495 = vmatpush.bf16.msra.mxu0 %v1217_v12  ;;  %v1158_v12 = vld [vmem:[%s1557_s2 + $0x30] sm:$0xf] }
  0x26   : > { %544 = vmatpush.bf16.msra.mxu1 %v1225_v13  ;;  %v1239_v13 = vld [vmem:[%s1557_s2 + $0x34] sm:$0xf0] }
  0x27   : > { %745 = vmatpush.bf16.msra.mxu2 %v1167_v10  ;;  %v1159_v16 = vor.u32 %v1239_v13, %v1158_v12 }
  0x28   : > { %794 = vmatpush.bf16.msra.mxu3 %v1171_v11 }
  0x29   : > { %496 = vmatpush.bf16.msra.mxu0 %v1216_v14  ;;  %v1238_v14 = vld [vmem:[%s1557_s2 + $0x34] sm:$0xf] }
  0x2a   : > { %545 = vmatpush.bf16.msra.mxu1 %v1224_v15  ;;  %v1160_v15 = vld [vmem:[%s1557_s2 + $0x38] sm:$0xf0] }
  0x2b   : > { %v1163_v18 = vor.u32 %v1238_v14, %v1160_v15  ;;  %746 = vmatpush.bf16.msra.mxu2 %v1159_v16 }
  0x2c   : > { %497 = vmatmul.bf16.vlgmr.msra.gmra.mxu0 %v1007_v20  ;;  %v1212_v20 = vld [vmem:[%s1387_s24 + $0x64] sm:$0xf] }
  0x2d   : > { %546 = vmatmul.bf16.vlgmr.msra.gmra.mxu1 %v1011_v21  ;;  %v1056_v21 = vld [vmem:[%s1387_s24 + $0x68] sm:$0xf0]  ;;  %795 = vmatpush.bf16.msra.mxu3 %v1163_v18 }
  0x2e   : > { %v1059_v23 = vor.u32 %v1212_v20, %v1056_v21 }
  0x3c   : > { %502 = vmatmul.bf16.gmra.mxu0 %v1015_v26  ;;  %v1236_v26 = vld [vmem:[%s1557_s2 + $0x24] sm:$0xf] }
  0x3d   : > { %551 = vmatmul.bf16.gmra.mxu1 %v1019_v27  ;;  %v1151_v27 = vor.u32 %v1237_v25, %v1150_v24  ;;  %v1155_v29 = vor.u32 %v1236_v26, %v1152_v28 }
  0x3f   : > { %747 = vmatpush.bf16.msra.mxu2 %v1151_v27  ;;  %796 = vmatpush.bf16.msra.mxu3 %v1155_v29 }
  0x4c   : > { %507 = vmatmul.bf16.gmra.mxu0 %v1023_v32  ;;  %v1234_v32 = vld [vmem:[%s1557_s2 + $0x14] sm:$0xf] }
  0x4d   : > { %556 = vmatmul.bf16.gmra.mxu1 %v1027_v33  ;;  %v1143_v33 = vor.u32 %v1235_v31, %v1142_v30  ;;  %v1147_v35 = vor.u32 %v1234_v32, %v1144_v34 }
  0x4f   : > { %748 = vmatpush.bf16.msra.mxu2 %v1143_v33  ;;  %797 = vmatpush.bf16.msra.mxu3 %v1147_v35 }
  0x5c   : > { %512 = vmatmul.bf16.gmra.mxu0 %v1031_v38  ;;  %v1232_v38 = vld [vmem:[%s1557_s2 + $0x4] sm:$0xf] }
  0x5d   : > { %561 = vmatmul.bf16.gmra.mxu1 %v1035_v39  ;;  %v1135_v39 = vor.u32 %v1233_v37, %v1134_v36  ;;  %v1139_v41 = vor.u32 %v1232_v38, %v1136_v40 }
  0x5f   : > { %749 = vmatpush.bf16.msra.mxu2 %v1135_v39  ;;  %798 = vmatpush.bf16.msra.mxu3 %v1139_v41 }
  0x6c   : > { %517 = vmatmul.bf16.gmra.mxu0 %v1039_v44  ;;  %v1214_v44 = vld [vmem:[%s1387_s24 + $0x74] sm:$0xf] }
  0x6d   : > { %566 = vmatmul.bf16.gmra.mxu1 %v1043_v45  ;;  %v1064_v45 = vld [vmem:[%s1387_s24 + $0x78] sm:$0xf0] }
  0x6e   : > { %v1067_v47 = vor.u32 %v1214_v44, %v1064_v45 }
  0x7c   : > { %522 = vmatmul.bf16.gmra.mxu0 %v1047_v62 }
  0x7d   : > { %571 = vmatmul.bf16.gmra.mxu1 %v1051_v63 }
  0x8c   : > { %527 = vmatmul.bf16.gmra.mxu0 %v1055_v22 }
  0x8d   : > { %576 = vmatmul.bf16.gmra.mxu1 %v1059_v23 }
  0x9c   : > { %532 = vmatmul.bf16.gmra.mxu0 %v1063_v46 }
  0x9d   : > { %581 = vmatmul.bf16.gmra.mxu1 %v1067_v47 }
  0xa9   : > { %v498_v48 = vpop.f32.mrf.mxu0 }
  0xaa   : > { %v547_v49 = vpop.f32.mrf.mxu1 }
  0xab   : > { %v548_v52 = vadd.f32 %v547_v49, %v498_v48 }
  0xb1   : > { %v500_v50 = vpop.f32.mrf.mxu0 }
  0xb2   : > { %v549_v51 = vpop.f32.mrf.mxu1 }
  0xb3   : > { %v550_v53 = vadd.f32 %v549_v51, %v500_v50 }
  0xb5   : > { %v638_v54 = vpack.c.bf16 %v550_v53, %v548_v52 }
  0xb7   : > { %750 = vmatmul.bf16.vlgmr.msra.gmra.mxu2 %v638_v54  ;;  %799 = vmatmul.bf16.vlgmr.msra.gmra.mxu3 %v638_v54 }
  0xb9   : > { %v503_v55 = vpop.f32.mrf.mxu0 }
  0xba   : > { %v552_v56 = vpop.f32.mrf.mxu1 }
  0xbb   : > { %v553_v59 = vadd.f32 %v552_v56, %v503_v55 }
  0xc1   : > { %v505_v57 = vpop.f32.mrf.mxu0 }
  0xc2   : > { %v554_v58 = vpop.f32.mrf.mxu1 }
  0xc3   : > { %v555_v60 = vadd.f32 %v554_v58, %v505_v57 }
  0xc5   : > { %v639_v61 = vpack.c.bf16 %v555_v60, %v553_v59 }
  0xc7   : > { %755 = vmatmul.bf16.gmra.mxu2 %v639_v61  ;;  %804 = vmatmul.bf16.gmra.mxu3 %v639_v61 }
  0xc9   : > { %v508_v62 = vpop.f32.mrf.mxu0 }
  0xca   : > { %v557_v63 = vpop.f32.mrf.mxu1 }
  0xcb   : > { %v558_v2 = vadd.f32 %v557_v63, %v508_v62 }
  0xd1   : > { %v510_v0 = vpop.f32.mrf.mxu0 }
  0xd2   : > { %v559_v1 = vpop.f32.mrf.mxu1 }
  0xd3   : > { %v560_v3 = vadd.f32 %v559_v1, %v510_v0 }
  0xd5   : > { %v640_v4 = vpack.c.bf16 %v560_v3, %v558_v2 }
  0xd7   : > { %760 = vmatmul.bf16.gmra.mxu2 %v640_v4  ;;  %809 = vmatmul.bf16.gmra.mxu3 %v640_v4 }
  0xd9   : > { %v513_v5 = vpop.f32.mrf.mxu0 }
  0xda   : > { %v562_v6 = vpop.f32.mrf.mxu1 }
  0xdb   : > { %v563_v9 = vadd.f32 %v562_v6, %v513_v5 }
  0xe1   : > { %v515_v7 = vpop.f32.mrf.mxu0 }
  0xe2   : > { %v564_v8 = vpop.f32.mrf.mxu1 }
  0xe3   : > { %v565_v10 = vadd.f32 %v564_v8, %v515_v7 }
  0xe5   : > { %v641_v11 = vpack.c.bf16 %v565_v10, %v563_v9 }
  0xe7   : > { %765 = vmatmul.bf16.gmra.mxu2 %v641_v11  ;;  %814 = vmatmul.bf16.gmra.mxu3 %v641_v11 }
  0xe9   : > { %v518_v12 = vpop.f32.mrf.mxu0 }
  0xea   : > { %v567_v13 = vpop.f32.mrf.mxu1 }
  0xeb   : > { %v568_v16 = vadd.f32 %v567_v13, %v518_v12 }
  0xf1   : > { %v520_v14 = vpop.f32.mrf.mxu0 }
  0xf2   : > { %v569_v15 = vpop.f32.mrf.mxu1 }
  0xf3   : > { %v570_v17 = vadd.f32 %v569_v15, %v520_v14 }
  0xf5   : > { %v642_v18 = vpack.c.bf16 %v570_v17, %v568_v16 }
  0xf7   : > { %770 = vmatmul.bf16.gmra.mxu2 %v642_v18  ;;  %819 = vmatmul.bf16.gmra.mxu3 %v642_v18 }
  0xf9   : > { %v523_v19 = vpop.f32.mrf.mxu0 }
  0xfa   : > { %v572_v20 = vpop.f32.mrf.mxu1 }
  0xfb   : > { %v573_v23 = vadd.f32 %v572_v20, %v523_v19 }
 0x101   : > { %v525_v21 = vpop.f32.mrf.mxu0 }
 0x102   : > { %v574_v22 = vpop.f32.mrf.mxu1 }
 0x103   : > { %v575_v24 = vadd.f32 %v574_v22, %v525_v21 }
 0x105   : > { %v643_v25 = vpack.c.bf16 %v575_v24, %v573_v23 }
 0x107   : > { %775 = vmatmul.bf16.gmra.mxu2 %v643_v25  ;;  %824 = vmatmul.bf16.gmra.mxu3 %v643_v25 }
 0x109   : > { %v528_v26 = vpop.f32.mrf.mxu0 }
 0x10a   : > { %v577_v27 = vpop.f32.mrf.mxu1 }
 0x10b   : > { %v578_v30 = vadd.f32 %v577_v27, %v528_v26 }
 0x111   : > { %v530_v28 = vpop.f32.mrf.mxu0 }
 0x112   : > { %v579_v29 = vpop.f32.mrf.mxu1 }
 0x113   : > { %v580_v31 = vadd.f32 %v579_v29, %v530_v28 }
 0x115   : > { %v644_v32 = vpack.c.bf16 %v580_v31, %v578_v30 }
 0x117   : > { %780 = vmatmul.bf16.gmra.mxu2 %v644_v32  ;;  %829 = vmatmul.bf16.gmra.mxu3 %v644_v32 }
 0x119   : > { %v533_v33 = vpop.f32.mrf.mxu0 }
 0x11a   : > { %v582_v34 = vpop.f32.mrf.mxu1 }
 0x11b   : > { %v583_v37 = vadd.f32 %v582_v34, %v533_v33 }
 0x121   : > { %v535_v35 = vpop.f32.mrf.mxu0 }
 0x122   : > { %v584_v36 = vpop.f32.mrf.mxu1 }
 0x123   : > { %v585_v38 = vadd.f32 %v584_v36, %v535_v35 }
 0x125   : > { %v645_v39 = vpack.c.bf16 %v585_v38, %v583_v37 }
 0x127   : > { %785 = vmatmul.bf16.gmra.mxu2 %v645_v39  ;;  %834 = vmatmul.bf16.gmra.mxu3 %v645_v39 }
 0x13a   : > { %v751_v40 = vpop.f32.mrf.mxu2  ;;  %v800_v41 = vpop.f32.mrf.mxu3 }
 0x13b   : > { %v840_v42 = vmax.f32 %v751_v40, 0.0  ;;  %v841_v43 = vmax.f32 %v800_v41, 0.0 }
 0x13d   : > { %v872_v44 = vpack.c.bf16 %v841_v43, %v840_v42 }
 0x13f   : > { %888 = vst [vmem:[%s1528_s5] sm:$0xff] %v872_v44 }
 0x142   : > { %v753_v45 = vpop.f32.mrf.mxu2  ;;  %v802_v46 = vpop.f32.mrf.mxu3 }
 0x143   : > { %v842_v47 = vmax.f32 %v753_v45, 0.0  ;;  %v843_v48 = vmax.f32 %v802_v46, 0.0 }
 0x145   : > { %v873_v49 = vpack.c.bf16 %v843_v48, %v842_v47 }
 0x147   : > { %889 = vst [vmem:[%s1528_s5 + $0x8] sm:$0xff] %v873_v49 }
 0x14a   : > { %v756_v50 = vpop.f32.mrf.mxu2  ;;  %v805_v51 = vpop.f32.mrf.mxu3 }
 0x14b   : > { %v844_v52 = vmax.f32 %v756_v50, 0.0  ;;  %v845_v53 = vmax.f32 %v805_v51, 0.0 }
 0x14d   : > { %v874_v54 = vpack.c.bf16 %v845_v53, %v844_v52 }
 0x14f   : > { %890 = vst [vmem:[%s1528_s5 + $0x10] sm:$0xff] %v874_v54 }
 0x152   : > { %v758_v55 = vpop.f32.mrf.mxu2  ;;  %v807_v56 = vpop.f32.mrf.mxu3 }
 0x153   : > { %v846_v57 = vmax.f32 %v758_v55, 0.0  ;;  %v847_v58 = vmax.f32 %v807_v56, 0.0 }
 0x155   : > { %v875_v59 = vpack.c.bf16 %v847_v58, %v846_v57 }
 0x157   : > { %891 = vst [vmem:[%s1528_s5 + $0x18] sm:$0xff] %v875_v59 }
 0x15a   : > { %v761_v60 = vpop.f32.mrf.mxu2  ;;  %v810_v61 = vpop.f32.mrf.mxu3 }
 0x15b   : > { %v848_v62 = vmax.f32 %v761_v60, 0.0  ;;  %v849_v63 = vmax.f32 %v810_v61, 0.0 }
 0x15d   : > { %v876_v0 = vpack.c.bf16 %v849_v63, %v848_v62 }
 0x15f   : > { %892 = vst [vmem:[%s1528_s5 + $0x20] sm:$0xff] %v876_v0 }
 0x162   : > { %v763_v1 = vpop.f32.mrf.mxu2  ;;  %v812_v2 = vpop.f32.mrf.mxu3 }
 0x163   : > { %v850_v3 = vmax.f32 %v763_v1, 0.0  ;;  %v851_v4 = vmax.f32 %v812_v2, 0.0 }
 0x165   : > { %v877_v5 = vpack.c.bf16 %v851_v4, %v850_v3 }
 0x167   : > { %893 = vst [vmem:[%s1528_s5 + $0x28] sm:$0xff] %v877_v5 }
 0x16a   : > { %v766_v6 = vpop.f32.mrf.mxu2  ;;  %v815_v7 = vpop.f32.mrf.mxu3 }
 0x16b   : > { %v852_v8 = vmax.f32 %v766_v6, 0.0  ;;  %v853_v9 = vmax.f32 %v815_v7, 0.0 }
 0x16d   : > { %v878_v10 = vpack.c.bf16 %v853_v9, %v852_v8 }
 0x16f   : > { %894 = vst [vmem:[%s1528_s5 + $0x30] sm:$0xff] %v878_v10 }
 0x172   : > { %v768_v11 = vpop.f32.mrf.mxu2  ;;  %v817_v12 = vpop.f32.mrf.mxu3 }
 0x173   : > { %v854_v13 = vmax.f32 %v768_v11, 0.0  ;;  %v855_v14 = vmax.f32 %v817_v12, 0.0 }
 0x175   : > { %v879_v15 = vpack.c.bf16 %v855_v14, %v854_v13 }
 0x177   : > { %895 = vst [vmem:[%s1528_s5 + $0x38] sm:$0xff] %v879_v15 }
 0x17a   : > { %v771_v16 = vpop.f32.mrf.mxu2  ;;  %v820_v17 = vpop.f32.mrf.mxu3 }
 0x17b   : > { %v856_v18 = vmax.f32 %v771_v16, 0.0  ;;  %v857_v19 = vmax.f32 %v820_v17, 0.0 }
 0x17d   : > { %v880_v20 = vpack.c.bf16 %v857_v19, %v856_v18 }
 0x17f   : > { %896 = vst [vmem:[%s1528_s5 + $0x40] sm:$0xff] %v880_v20 }
 0x182   : > { %v773_v21 = vpop.f32.mrf.mxu2  ;;  %v822_v22 = vpop.f32.mrf.mxu3 }
 0x183   : > { %v858_v23 = vmax.f32 %v773_v21, 0.0  ;;  %v859_v24 = vmax.f32 %v822_v22, 0.0 }
 0x185   : > { %v881_v25 = vpack.c.bf16 %v859_v24, %v858_v23 }
 0x187   : > { %897 = vst [vmem:[%s1528_s5 + $0x48] sm:$0xff] %v881_v25 }
 0x18a   : > { %v776_v26 = vpop.f32.mrf.mxu2  ;;  %v825_v27 = vpop.f32.mrf.mxu3 }
 0x18b   : > { %v860_v28 = vmax.f32 %v776_v26, 0.0  ;;  %v861_v29 = vmax.f32 %v825_v27, 0.0 }
 0x18d   : > { %v882_v30 = vpack.c.bf16 %v861_v29, %v860_v28 }
 0x18f   : > { %898 = vst [vmem:[%s1528_s5 + $0x50] sm:$0xff] %v882_v30 }
 0x192   : > { %v778_v31 = vpop.f32.mrf.mxu2  ;;  %v827_v32 = vpop.f32.mrf.mxu3 }
 0x193   : > { %v862_v33 = vmax.f32 %v778_v31, 0.0  ;;  %v863_v34 = vmax.f32 %v827_v32, 0.0 }
 0x195   : > { %v883_v35 = vpack.c.bf16 %v863_v34, %v862_v33 }
 0x197   : > { %899 = vst [vmem:[%s1528_s5 + $0x58] sm:$0xff] %v883_v35 }
 0x19a   : > { %v781_v36 = vpop.f32.mrf.mxu2  ;;  %v830_v37 = vpop.f32.mrf.mxu3 }
 0x19b   : > { %v864_v38 = vmax.f32 %v781_v36, 0.0  ;;  %v865_v39 = vmax.f32 %v830_v37, 0.0 }
 0x19d   : > { %v884_v40 = vpack.c.bf16 %v865_v39, %v864_v38 }
 0x19f   : > { %900 = vst [vmem:[%s1528_s5 + $0x60] sm:$0xff] %v884_v40 }
 0x1a2   : > { %v783_v41 = vpop.f32.mrf.mxu2  ;;  %v832_v42 = vpop.f32.mrf.mxu3 }
 0x1a3   : > { %v866_v43 = vmax.f32 %v783_v41, 0.0  ;;  %v867_v44 = vmax.f32 %v832_v42, 0.0 }
 0x1a5   : > { %v885_v45 = vpack.c.bf16 %v867_v44, %v866_v43 }
 0x1a7   : > { %901 = vst [vmem:[%s1528_s5 + $0x68] sm:$0xff] %v885_v45 }
 0x1aa   : > { %v786_v46 = vpop.f32.mrf.mxu2  ;;  %v835_v47 = vpop.f32.mrf.mxu3 }
 0x1ab   : > { %v868_v48 = vmax.f32 %v786_v46, 0.0  ;;  %v869_v49 = vmax.f32 %v835_v47, 0.0 }
 0x1ad   : > { %v886_v50 = vpack.c.bf16 %v869_v49, %v868_v48 }
 0x1af   : > { %902 = vst [vmem:[%s1528_s5 + $0x70] sm:$0xff] %v886_v50 }
 0x1b2   : > { %v788_v51 = vpop.f32.mrf.mxu2  ;;  %v837_v52 = vpop.f32.mrf.mxu3 }
 0x1b3   : > { %v870_v53 = vmax.f32 %v788_v51, 0.0  ;;  %v871_v54 = vmax.f32 %v837_v52, 0.0 }
 0x1b5   : > { %v887_v55 = vpack.c.bf16 %v871_v54, %v870_v53 }
 0x1b7   : > { %903 = vst [vmem:[%s1528_s5 + $0x78] sm:$0xff] %v887_v55 }
 0x1b8 PF: > { %s13_s14 = sadd.s32 1, %s1294_s14   ;;  %s1559_s12 = smov %s1290_s13 }
 0x1b9   : > { %p10_p5 = scmp.ge.s32.totalorder %s13_s14, 4   ;;  %s1560_s13 = smov %s1562_s15 }
 0x1bb   :  { %12 = sbr.rel (!%p10_p5) target bundleno = 2 (0x2), region = 73 }

</bundles_post_ra>
